<compile_context>
chip_gen: v7x
topology: tpu7x:2x2x1
jax: 0.10.0
libtpu: 0.0.40
codegen_flags: <defaults>
</compile_context>

<pallas_src>
import functools

import jax
import jax.numpy as jnp
from jax import lax
from jax.experimental import pallas as pl
from jax.experimental.pallas import tpu as pltpu


def _round_up(x, m):
    return ((x + m - 1) // m) * m


def _vmem_capacity_bytes():
    """Per-core VMEM capacity; conservative (v7x) fallback if the query fails."""
    try:
        info = pltpu.get_tpu_info()
        for name in ("vmem_capacity_bytes", "vmem_size_bytes", "vmem_bytes"):
            cap = getattr(info, name, None)
            if cap:
                return int(cap)
    except Exception:
        pass
    return 64 * 1024 * 1024


def _vmem_estimate(bblk, oblk, n_lblk, n_tok, d_p, p_p, itemsize):
    """Rough bytes resident in VMEM for one grid step (all buffers + big temps)."""
    m = bblk * n_tok
    rc_pad = _round_up(oblk, 128)
    cw = oblk * p_p + rc_pad
    b = 0
    b += 2 * bblk * n_tok * d_p * itemsize          # feature block (double buffered)
    b += 2 * bblk * oblk * n_tok * n_tok * 4        # output block (double buffered, f32)
    b += (d_p * 2 * p_p) * itemsize + 2 * p_p * 4   # wproj (single buffered) + bproj
    wbuf = 1 if n_lblk == 1 else 2                  # chunked weights need double buffer
    b += wbuf * (p_p * cw * itemsize + cw * 4)      # wbig + bbig
    b += m * 2 * p_p * itemsize                     # xy scratch
    b += m * cw * 4                                 # t_full temp (f32)
    b += 2 * oblk * n_tok * p_p * 4                 # label-major lhs slab + staging
    b += 2 * oblk * n_tok * n_tok * 4               # s slab + store staging
    return b


def _choose_blocks(batch, n_labels, n_tok, d_p, p_p, itemsize, budget,
                   max_label_block=None):
    """Pick (bblk, oblk, n_lblk): biggest label chunk first, then biggest batch block."""
    max_ob = min(n_labels, max_label_block) if max_label_block else min(n_labels, 16)
    max_bb = min(batch, 8)
    if batch >= 2:
        # Keep >=2 batch blocks so the "parallel" axis shards across v7x's two cores.
        max_bb = min(max_bb, (batch + 1) // 2)
    max_bb = max(max_bb, 1)
    for oblk in range(max_ob, 0, -1):
        n_lblk = -(-n_labels // oblk)
        for bblk in range(max_bb, 0, -1):
            if _vmem_estimate(bblk, oblk, n_lblk, n_tok, d_p, p_p, itemsize) <= budget:
                return bblk, oblk, n_lblk
    return 1, 1, n_labels


def _biaffine_kernel(feat_ref, wproj_ref, bproj_ref, wbig_ref, bbig_ref, out_ref,
                     xy_ref, *, n_tok, proj_p, bblk, oblk):
    """Grid = (batch blocks [parallel], label chunks [arbitrary, innermost]).

    feat_ref : (bblk, Np, Dp)              consumed only at chunk 0
    wproj_ref: (Dp, 2*Pp)                  fused head|mod projection (grid invariant)
    bproj_ref: (1, 2*Pp)                   f32
    wbig_ref : (Pp, oblk*Pp + rc_pad)      per-chunk fused [W2 | wcol^T]
    bbig_ref : (1, oblk*Pp + rc_pad)       per-chunk fused [wrow | w00 + output_bias]
    out_ref  : (bblk, oblk, Np, Np)        f32
    xy_ref   : (bblk*Np, 2*Pp) scratch     tanh'd projections, cached across chunks
    """
    c = pl.program_id(1)
    m = bblk * n_tok

    @pl.when(c == 0)
    def _():
        f = feat_ref[...].reshape(m, feat_ref.shape[-1])
        proj = jnp.dot(f, wproj_ref[...], preferred_element_type=jnp.float32)
        xy_ref[...] = jnp.tanh(proj + bproj_ref[...]).astype(xy_ref.dtype)

    x = xy_ref[:, pl.ds(0, proj_p)]                           # (M, Pp) head projection

    # ONE wide matmul: t_full[:, :oblk*Pp] = x @ W2 (+ wrow fold over y),
    #                  t_full[:, oblk*Pp:] = x @ wcol^T (+ w00 + output_bias) = rc.
    t_full = (jnp.dot(x, wbig_ref[...], preferred_element_type=jnp.float32)
              + bbig_ref[...])                                # (M, oblk*Pp + rc_pad)

    # rc[i, o] broadcast over the mod-token axis; transpose once for the whole block.
    rc_t = jnp.transpose(t_full[:, oblk * proj_p:])           # (rc_pad, M)

    for b in range(bblk):                                     # bblk <= 8: small unroll
        lo = b * n_tok
        y_b = xy_ref[pl.ds(lo, n_tok), pl.ds(proj_p, proj_p)]  # (Np, Pp) mod projection
        t_b = t_full[lo:lo + n_tok, :]

        # Label-major slab (oblk*Np, Pp) from lane-aligned slices -> ONE tall matmul
        # for all labels of this chunk (replaces O tiny per-label matmuls).
        lhs = jnp.concatenate(
            [t_b[:, o * proj_p:(o + 1) * proj_p] for o in range(oblk)], axis=0)

        s = lax.dot_general(lhs.astype(y_b.dtype), y_b,
                            (((1,), (1,)), ((), ())),
                            preferred_element_type=jnp.float32)   # (oblk*Np, Np)
        s = s.reshape(oblk, n_tok, n_tok)
        out_ref[b] = s + rc_t[:oblk, lo:lo + n_tok][:, :, None]


def batched_biaffine(features, params, *, use_bf16=False, max_label_block=None,
                     torch_layout=True):
    """features: (B, N, D) f32 -> scores (B, N, N, O) f32 (PyTorch layout)."""
    B, N, D = features.shape
    wh, bh = params["head_w"], params["head_b"]
    wm, bm = params["mod_w"], params["mod_b"]
    w, ob = params["weight"], params["output_bias"]
    P = wh.shape[1]
    O = w.shape[0]

    cdt = jnp.bfloat16 if use_bf16 else jnp.float32
    itemsize = 2 if use_bf16 else 4
    f32 = jnp.float32

    # Lane/sublane padding: zero-padded contraction columns are numerically free;
    # Np multiple of 128 keeps every (N, N) output store lane-dense (unmasked vst).
    Np = _round_up(N, 128)
    Dp = _round_up(D, 128)
    Pp = _round_up(P, 128)

    vmem_cap = _vmem_capacity_bytes()
    vmem_limit = max(32 * 1024 * 1024, min(vmem_cap, 128 * 1024 * 1024) - (4 << 20))
    budget = int(0.70 * vmem_limit)          # leave headroom for compiler scratch

    bblk, oblk, n_lblk = _choose_blocks(B, O, Np, Dp, Pp, itemsize, budget,
                                        max_label_block)
    O_pad = n_lblk * oblk
    rc_pad = _round_up(oblk, 128)
    chunk_w = oblk * Pp + rc_pad
    n_bblk = -(-B // bblk)
    Bp = n_bblk * bblk

    # ---- wrapper-side repacking (cheap; constant-folds under jit) ----
    feat = jnp.zeros((Bp, Np, Dp), cdt).at[:B, :N, :D].set(features.astype(cdt))

    wproj = jnp.zeros((Dp, 2 * Pp), f32).at[:D, :P].set(wh).at[:D, Pp:Pp + P].set(wm)
    bproj = jnp.zeros((1, 2 * Pp), f32).at[:, :P].set(bh).at[:, Pp:Pp + P].set(bm)
    wproj = wproj.astype(cdt)

    # Bias row/column removed algebraically: with xb=[x,1], yb=[y,1]
    #   s[o] = x W11[o] y^T + (x.wcol[o]) 1^T + 1 (wrow[o] y^T) + w00[o] + ob[o]
    w2 = jnp.zeros((Pp, O_pad, Pp), f32).at[:P, :O, :P].set(
        jnp.transpose(w[:, :P, :P], (1, 0, 2)))
    colT = jnp.zeros((Pp, O_pad), f32).at[:P, :O].set(jnp.transpose(w[:, :P, P]))
    colT = jnp.pad(colT.reshape(Pp, n_lblk, oblk),
                   ((0, 0), (0, 0), (0, rc_pad - oblk)))
    wbig = jnp.concatenate([w2.reshape(Pp, n_lblk, oblk * Pp), colT], axis=2)
    wbig = wbig.reshape(Pp, n_lblk * chunk_w).astype(cdt)

    wrow = jnp.zeros((1, O_pad, Pp), f32).at[0, :O, :P].set(w[:, P, :P])
    bias = jnp.zeros((1, O_pad), f32).at[0, :O].set(w[:, P, P] + ob[0])
    bias = jnp.pad(bias.reshape(1, n_lblk, oblk), ((0, 0), (0, 0), (0, rc_pad - oblk)))
    bbig = jnp.concatenate([wrow.reshape(1, n_lblk, oblk * Pp), bias], axis=2)
    bbig = bbig.reshape(1, n_lblk * chunk_w)                     # stays f32

    kernel = functools.partial(_biaffine_kernel, n_tok=Np, proj_p=Pp,
                               bblk=bblk, oblk=oblk)

    def _spec(shape, index_map, single_buffer):
        if single_buffer:  # grid-invariant blocks: no benefit from double buffering
            return pl.BlockSpec(shape, index_map, pipeline_mode=pl.Buffered(1))
        return pl.BlockSpec(shape, index_map)

    out_full = pl.pallas_call(
        kernel,
        out_shape=jax.ShapeDtypeStruct((Bp, O_pad, Np, Np), jnp.float32),
        grid_spec=pltpu.PrefetchScalarGridSpec(
            num_scalar_prefetch=0,
            grid=(n_bblk, n_lblk),
            in_specs=[
                pl.BlockSpec((bblk, Np, Dp), lambda b, c: (b, 0, 0)),
                _spec((Dp, 2 * Pp), lambda b, c: (0, 0), True),
                _spec((1, 2 * Pp), lambda b, c: (0, 0), True),
                _spec((Pp, chunk_w), lambda b, c: (0, c), n_lblk == 1),
                _spec((1, chunk_w), lambda b, c: (0, c), n_lblk == 1),
            ],
            out_specs=pl.BlockSpec((bblk, oblk, Np, Np), lambda b, c: (b, c, 0, 0)),
            scratch_shapes=[pltpu.VMEM((bblk * Np, 2 * Pp), cdt)],
        ),
        compiler_params=pltpu.CompilerParams(
            dimension_semantics=("parallel", "arbitrary"),
            vmem_limit_bytes=vmem_limit,
        ),
    )(feat, wproj, bproj, wbig, bbig)

    out = out_full[:B, :O, :N, :N]
    if torch_layout:
        # TODO(synk): drop this extra HBM pass once downstream accepts (B, O, N, N);
        # the kernel's native layout is already lane-dense and output-BW optimal.
        out = jnp.transpose(out, (0, 2, 3, 1))
    return out


def reference_biaffine(features, params):
    """Pure-JAX reference mirroring the PyTorch forward."""
    x = jnp.tanh(features @ params["head_w"] + params["head_b"][0])
    y = jnp.tanh(features @ params["mod_w"] + params["mod_b"][0])
    ones = jnp.ones(x.shape[:-1] + (1,), x.dtype)
    xb = jnp.concatenate([x, ones], -1)
    yb = jnp.concatenate([y, ones], -1)
    s = jnp.einsum("bxi,oij,byj->boxy", xb, params["weight"], yb)
    s = jnp.transpose(s, (0, 2, 3, 1))
    return s + params["output_bias"][0][None, None, None, :]


if __name__ == "__main__":
    def _make(key, B, N, D, P, O):
        kf, k1, k2, k3, k4, k5, k6 = jax.random.split(key, 7)
        feats = jax.random.normal(kf, (B, N, D), dtype=jnp.float32)
        # Note: the module's reset_parameters zeros weight/output_bias; use small
        # random values so the kernel computes something nontrivial.
        params = {
            "head_w": jax.random.normal(k1, (D, P), jnp.float32) * 0.1,
            "head_b": jax.random.normal(k2, (1, P), jnp.float32) * 0.1,
            "mod_w": jax.random.normal(k3, (D, P), jnp.float32) * 0.1,
            "mod_b": jax.random.normal(k4, (1, P), jnp.float32) * 0.1,
            "weight": jax.random.normal(k5, (O, P + 1, P + 1), jnp.float32) * 0.1,
            "output_bias": jax.random.normal(k6, (1, O), jnp.float32) * 0.1,
        }
        return feats, params

    key = jax.random.PRNGKey(0)
    key1, key2 = jax.random.split(key)

    # 1) Base config, f32.
    feats, params = _make(key1, B=2, N=8, D=32, P=32, O=4)
    out = jax.block_until_ready(batched_biaffine(feats, params))
    ref = reference_biaffine(feats, params)
    assert out.shape == ref.shape, (out.shape, ref.shape)
    assert jnp.allclose(out, ref, atol=2e-4, rtol=2e-4), float(
        jnp.max(jnp.abs(out - ref)))

    # 2) Unaligned shapes + forced label chunking: exercises batch/token/feature/proj/
    #    label padding and the multi-chunk ("arbitrary") grid axis.
    feats2, params2 = _make(key2, B=3, N=10, D=20, P=17, O=5)
    out2 = jax.block_until_ready(
        batched_biaffine(feats2, params2, max_label_block=2))
    ref2 = reference_biaffine(feats2, params2)
    assert out2.shape == ref2.shape, (out2.shape, ref2.shape)
    assert jnp.allclose(out2, ref2, atol=2e-4, rtol=2e-4), float(
        jnp.max(jnp.abs(out2 - ref2)))

    # 3) bf16 MXU fast path (v6e/v7x); looser tolerance vs. the f32 reference.
    out3 = jax.block_until_ready(batched_biaffine(feats, params, use_bf16=True))
    assert jnp.allclose(out3, ref, atol=5e-2, rtol=5e-2), float(
        jnp.max(jnp.abs(out3 - ref)))

    print("KERNEL_OK")
</pallas_src>

<mosaic_0001>
module attributes {stable_mosaic.version = 11 : i64} {
  func.func @_biaffine_kernel(%arg0: i32, %arg1: i32, %arg2: memref<1x128x128xf32, #tpu.memory_space<vmem>>, %arg3: memref<128x256xf32, #tpu.memory_space<vmem>>, %arg4: memref<1x256xf32, #tpu.memory_space<vmem>>, %arg5: memref<128x640xf32, #tpu.memory_space<vmem>>, %arg6: memref<1x640xf32, #tpu.memory_space<vmem>>, %arg7: memref<1x4x128x128xf32, #tpu.memory_space<vmem>>, %arg8: memref<128x256xf32, #tpu.memory_space<vmem>>) attributes {dimension_semantics = [#tpu.dimension_semantics<parallel>, #tpu.dimension_semantics<arbitrary>], iteration_bounds = array<i64: 2, 1>, scalar_prefetch = 0 : i64, scratch_operands = 1 : i64, tpu.core_type = #tpu.core_type<tc>, window_params = [{transform_indices = @transform_0, window_bounds = array<i64: 1, 128, 128>}, {pipeline_mode = #tpu.pipeline_mode<synchronous>, transform_indices = @transform_1, window_bounds = array<i64: 128, 256>}, {pipeline_mode = #tpu.pipeline_mode<synchronous>, transform_indices = @transform_2, window_bounds = array<i64: 1, 256>}, {pipeline_mode = #tpu.pipeline_mode<synchronous>, transform_indices = @transform_3, window_bounds = array<i64: 128, 640>}, {pipeline_mode = #tpu.pipeline_mode<synchronous>, transform_indices = @transform_4, window_bounds = array<i64: 1, 640>}, {transform_indices = @transform_5, window_bounds = array<i64: 1, 4, 128, 128>}]} {
    %c0_i32 = arith.constant 0 : i32
    %0 = arith.cmpi eq, %arg1, %c0_i32 : i32
    %1 = arith.extui %0 : i1 to i32
    %c0_i32_0 = arith.constant 0 : i32
    %2 = arith.cmpi ne, %1, %c0_i32_0 : i32
    scf.if %2 {
      %c0_12 = arith.constant 0 : index
      %c0_13 = arith.constant 0 : index
      %c0_14 = arith.constant 0 : index
      %26 = vector.load %arg2[%c0_12, %c0_13, %c0_14] : memref<1x128x128xf32, #tpu.memory_space<vmem>>, vector<1x128x128xf32>
      %27 = vector.shape_cast %26 : vector<1x128x128xf32> to vector<128x128xf32>
      %c0_15 = arith.constant 0 : index
      %c0_16 = arith.constant 0 : index
      %28 = vector.load %arg3[%c0_15, %c0_16] : memref<128x256xf32, #tpu.memory_space<vmem>>, vector<128x256xf32>
      %cst_17 = arith.constant dense<0.000000e+00> : vector<128x256xf32>
      %29 = tpu.matmul %27, %28, %cst_17 {dimension_numbers = #tpu.dot_dimension_numbers<[1], [0], [0], [1], [0, 0, 1, 1], [], []>} : vector<128x128xf32>, vector<128x256xf32>, vector<128x256xf32> -> vector<128x256xf32>
      %c0_18 = arith.constant 0 : index
      %c0_19 = arith.constant 0 : index
      %30 = vector.load %arg4[%c0_18, %c0_19] : memref<1x256xf32, #tpu.memory_space<vmem>>, vector<1x256xf32>
      %31 = vector.broadcast %30 : vector<1x256xf32> to vector<128x256xf32>
      %32 = arith.addf %29, %31 : vector<128x256xf32>
      %33 = math.tanh %32 : vector<128x256xf32>
      %c0_20 = arith.constant 0 : index
      %c0_21 = arith.constant 0 : index
      %34 = vector.load %arg8[%c0_20, %c0_21] : memref<128x256xf32, #tpu.memory_space<vmem>>, vector<128x256xf32>
      tpu.vector_store %arg8[%c0_20, %c0_21], %33 {strides = array<i32>} : memref<128x256xf32, #tpu.memory_space<vmem>>, vector<128x256xf32>,
    } else {
    }
    %c0 = arith.constant 0 : index
    %c0_1 = arith.constant 0 : index
    %3 = vector.load %arg8[%c0, %c0_1] : memref<128x256xf32, #tpu.memory_space<vmem>>, vector<128x128xf32>
    %c0_2 = arith.constant 0 : index
    %c0_3 = arith.constant 0 : index
    %4 = vector.load %arg5[%c0_2, %c0_3] : memref<128x640xf32, #tpu.memory_space<vmem>>, vector<128x640xf32>
    %cst = arith.constant dense<0.000000e+00> : vector<128x640xf32>
    %5 = tpu.matmul %3, %4, %cst {dimension_numbers = #tpu.dot_dimension_numbers<[1], [0], [0], [1], [0, 0, 1, 1], [], []>} : vector<128x128xf32>, vector<128x640xf32>, vector<128x640xf32> -> vector<128x640xf32>
    %c0_4 = arith.constant 0 : index
    %c0_5 = arith.constant 0 : index
    %6 = vector.load %arg6[%c0_4, %c0_5] : memref<1x640xf32, #tpu.memory_space<vmem>>, vector<1x640xf32>
    %7 = vector.broadcast %6 : vector<1x640xf32> to vector<128x640xf32>
    %8 = arith.addf %5, %7 : vector<128x640xf32>
    %9 = vector.extract_strided_slice %8 {offsets = [0, 512], sizes = [128, 128], strides = [1, 1]} : vector<128x640xf32> to vector<128x128xf32>
    %10 = tpu.transpose %9, [1, 0] : vector<128x128xf32> -> vector<128x128xf32>
    %c0_6 = arith.constant 0 : index
    %c128 = arith.constant 128 : index
    %11 = vector.load %arg8[%c0_6, %c128] : memref<128x256xf32, #tpu.memory_space<vmem>>, vector<128x128xf32>
    %12 = vector.extract_strided_slice %8 {offsets = [0, 0], sizes = [128, 128], strides = [1, 1]} : vector<128x640xf32> to vector<128x128xf32>
    %13 = vector.extract_strided_slice %8 {offsets = [0, 128], sizes = [128, 128], strides = [1, 1]} : vector<128x640xf32> to vector<128x128xf32>
    %14 = vector.extract_strided_slice %8 {offsets = [0, 256], sizes = [128, 128], strides = [1, 1]} : vector<128x640xf32> to vector<128x128xf32>
    %15 = vector.extract_strided_slice %8 {offsets = [0, 384], sizes = [128, 128], strides = [1, 1]} : vector<128x640xf32> to vector<128x128xf32>
    %16 = tpu.concatenate %12, %13, %14, %15 in 0 : vector<128x128xf32>, vector<128x128xf32>, vector<128x128xf32>, vector<128x128xf32> -> vector<512x128xf32>
    %cst_7 = arith.constant dense<0.000000e+00> : vector<512x128xf32>
    %17 = tpu.matmul %16, %11, %cst_7 {dimension_numbers = #tpu.dot_dimension_numbers<[1], [1], [0], [0], [0, 0, 1, 0], [], []>} : vector<512x128xf32>, vector<128x128xf32>, vector<512x128xf32> -> vector<512x128xf32>
    %18 = vector.shape_cast %17 : vector<512x128xf32> to vector<4x128x128xf32>
    %19 = vector.extract_strided_slice %10 {offsets = [0, 0], sizes = [4, 128], strides = [1, 1]} : vector<128x128xf32> to vector<4x128xf32>
    %20 = vector.shape_cast %19 : vector<4x128xf32> to vector<4x128x1xf32>
    %21 = vector.broadcast %20 : vector<4x128x1xf32> to vector<4x128x128xf32>
    %22 = arith.addf %18, %21 : vector<4x128x128xf32>
    %c0_8 = arith.constant 0 : index
    %c0_9 = arith.constant 0 : index
    %c0_10 = arith.constant 0 : index
    %c0_11 = arith.constant 0 : index
    %23 = vector.load %arg7[%c0_8, %c0_9, %c0_10, %c0_11] : memref<1x4x128x128xf32, #tpu.memory_space<vmem>>, vector<1x4x128x128xf32>
    %24 = vector.shape_cast %23 : vector<1x4x128x128xf32> to vector<4x128x128xf32>
    %25 = vector.shape_cast %22 : vector<4x128x128xf32> to vector<1x4x128x128xf32>
    tpu.vector_store %arg7[%c0_8, %c0_9, %c0_10, %c0_11], %25 {strides = array<i32>} : memref<1x4x128x128xf32, #tpu.memory_space<vmem>>, vector<1x4x128x128xf32>,
    return
  }
  func.func @transform_0(%arg0: i32, %arg1: i32) -> (i32, i32, i32) {
    %c0_i32 = arith.constant 0 : i32
    %c0_i32_0 = arith.constant 0 : i32
    %c0_i32_1 = arith.constant 0 : i32
    return %arg0, %c0_i32, %c0_i32_0 : i32, i32, i32
  }
  func.func @transform_1(%arg0: i32, %arg1: i32) -> (i32, i32) {
    %c0_i32 = arith.constant 0 : i32
    %c0_i32_0 = arith.constant 0 : i32
    %c0_i32_1 = arith.constant 0 : i32
    return %c0_i32, %c0_i32_0 : i32, i32
  }
  func.func @transform_2(%arg0: i32, %arg1: i32) -> (i32, i32) {
    %c0_i32 = arith.constant 0 : i32
    %c0_i32_0 = arith.constant 0 : i32
    %c0_i32_1 = arith.constant 0 : i32
    return %c0_i32, %c0_i32_0 : i32, i32
  }
  func.func @transform_3(%arg0: i32, %arg1: i32) -> (i32, i32) {
    %c0_i32 = arith.constant 0 : i32
    %c0_i32_0 = arith.constant 0 : i32
    return %c0_i32, %arg1 : i32, i32
  }
  func.func @transform_4(%arg0: i32, %arg1: i32) -> (i32, i32) {
    %c0_i32 = arith.constant 0 : i32
    %c0_i32_0 = arith.constant 0 : i32
    return %c0_i32, %arg1 : i32, i32
  }
  func.func @transform_5(%arg0: i32, %arg1: i32) -> (i32, i32, i32, i32) {
    %c0_i32 = arith.constant 0 : i32
    %c0_i32_0 = arith.constant 0 : i32
    %c0_i32_1 = arith.constant 0 : i32
    return %arg0, %arg1, %c0_i32, %c0_i32_0 : i32, i32, i32, i32
  }
}

</mosaic_0001>

<bundles_post_ra>
// kernel: tpu_custom_call.1
= control target key start
LH: loop header
LB: loop body
LE: loop exit
PB: predicated region body
PF: predicated region fallthrough
CT: control target
= control target key end

     0   :  { %10 = vsyncpa [#allocation4], 0  ;;  %s3913_s0 = inlined_call_operand.hbm [shape: f32[2,128,128], index: 0, kind: input, shape index: {}]   ;;  %s3914_s1 = inlined_call_operand.hbm [shape: f32[128,256], index: 1, kind: input, shape index: {}]   ;;  %s3915_s2 = inlined_call_operand.vmem [shape: f32[1,256], index: 2, kind: input, shape index: {}]   ;;  %s3916_s3 = inlined_call_operand.hbm [shape: f32[128,640], index: 3, kind: input, shape index: {}]   ;;  %s3917_s4 = inlined_call_operand.vmem [shape: f32[1,640], index: 4, kind: input, shape index: {}]   ;;  %s3918_s5 = inlined_call_operand.hbm [shape: f32[2,4,128,128], index: 5, kind: output, shape index: {}]  }
   0x1   :  { %12 = vsyncpa [#allocation4 + $0x1], 0 }
   0x2   :  { %13 = vsyncpa [#allocation7], 0 }
   0x3   :  { %14 = vsyncpa [#allocation5], 0 }
   0x4   :  { %16 = vsyncpa [#allocation5 + $0x1], 0  ;;  %s3008_s18 = smov 0   ;;  %s3010_s19 = smov 0  }
   0x5   :  { %s3012_s20 = smov 0   ;;  %s3014_s21 = smov 0  }
   0x6   :  { %s3016_s22 = smov 0   ;;  %s3018_s23 = smov 0  }
   0x7 LB: > { %s2157_s24 = sadd.s32 4294967295, %s2963_s23   ;;  %s2158_s25 = sadd.s32 4294967294, %s2963_s23   ;;  %s2963_s23 = sphi %s3018_s23, %s22_s23   ;;  %s2959_s22 = sphi %s3016_s22, %s3940_s22   ;;  %s2955_s21 = sphi %s3014_s21, %s3939_s21   ;;  %s2951_s20 = sphi %s3012_s20, %s3938_s20   ;;  %s2947_s19 = sphi %s3010_s19, %s3937_s19   ;;  %s2943_s18 = sphi %s3008_s18, %s3936_s18  }
   0x8   : > { %p54_p0 = scmp.ne.s32.totalorder %s2947_s19, %s2943_s18  ;;  %p3042_p1 = scmp.eq.s32.totalorder %s2157_s24, 0 }
   0x9   : > { %p3046_p2 = scmp.eq.s32.totalorder %s2157_s24, 1  ;;  %p180_p3 = scmp.eq.s32.totalorder %s2158_s25, 1 }
   0xa   : > { %s3923_s26 = scalar_select %p3042_p1, 1, 0 }
   0xb   : > { %p3052_p4 = por %p3042_p1, %p54_p0  ;;  %p2159_p5 = scmp.ge.s32.totalorder %s2963_s23, 1 }
   0xc   : > { %p3057_p6 = por %p180_p3, %p54_p0  ;;  %p187_p7 = scmp.lt.s32.totalorder %s2963_s23, 3 }
   0xd   : > { %s3925_s28 = scalar_select %p3052_p4, 1, 0 }
   0xe   : > { %s3926_s29 = scalar_select %p3057_p6, 1, 0 }
   0xf   : > { %p3062_p8 = pnand %p2159_p5, %p187_p7  ;;  %s2965_s6 = smov [#allocation6]  }
  0x10   : > { %s199_s7 = sshll.u32 %s2965_s6, 4  ;;  %s2966_s9 = smov [#allocation8]   ;;  %s3066_s7 = int_to_ptr.vmem [resolvable:$true] %s199_s7 }
  0x11   : > { %p2647_p9 = pneg %p3062_p8  ;;  %s218_s10 = sshll.u32 %s2966_s9, 4  ;;  %s3077_s10 = int_to_ptr.vmem [resolvable:$true] %s218_s10 }
  0x12   : > { %s2791_s13 = scalar_lea.hbm %s3914_s1, 4096 }
  0x13   : > { %p3073_p11 = pnand %p2647_p9, %p3042_p1  ;;  %p2792_p12 = scmp.ne.s32.totalorder %s3914_s1, %s2791_s13 }
  0x14   : > { %p2798_p5 = scmp.lt.u32.totalorder %s2791_s13, %s3914_s1 }
  0x15   : > { %p2793_p13 = pneg %p3073_p11 }
  0x17   : > { %p2794_p0 = pnand %p2793_p13, %p2792_p12 }
  0x19   : > { %p2795_p3 = pneg %p2794_p0 }
  0x1b   : > { %p2800_p7 = pnand %p2798_p5, %p2795_p3 }
  0x1d   : > { %2803 = shalt.err (!%p2800_p7)
}
  0x1e   : > { %s2804_s24 = scalar_lea.vmem %s3066_s7, 4096  ;;  %p2812_p1 = scmp.lt.s32.totalorder %s3066_s7, %s3066_s7 }
  0x1f   : > { %p2805_p9 = scmp.ne.s32.totalorder %s3066_s7, %s2804_s24  ;;  %p2813_p12 = scmp.lt.s32.totalorder %s2804_s24, %s2804_s24 }
  0x21   : > { %p2807_p10 = pnand %p2805_p9, %p2793_p13  ;;  %p2814_p0 = por %p2813_p12, %p2812_p1 }
  0x23   : > { %p2808_p6 = pneg %p2807_p10 }
  0x25   : > { %p2815_p4 = pnand %p2814_p0, %p2808_p6 }
  0x27   : > { %2818 = shalt.err (!%p2815_p4)
}
  0x28   : > { %s2967_s25 = smov 256   ;;  %s2968_s6 = smov 16  }
  0x29   : > { %2650 = dma.hbm_to_vmem [thread:$0]  (!%p3073_p11), %s3914_s1, 4096, %s3066_s7, [#allocation7], %s2967_s25, %s2967_s25, %s2968_s6  }
  0x2a   : > { %s2819_s14 = scalar_lea.hbm %s3916_s3, 10240 }
  0x2b   : > { %p2820_p1 = scmp.ne.s32.totalorder %s3916_s3, %s2819_s14  ;;  %p2826_p10 = scmp.lt.u32.totalorder %s2819_s14, %s3916_s3 }
  0x2d   : > { %p2822_p4 = pnand %p2820_p1, %p2793_p13 }
  0x2f   : > { %p2823_p6 = pneg %p2822_p4 }
  0x31   : > { %p2828_p3 = pnand %p2826_p10, %p2823_p6 }
  0x33   : > { %2831 = shalt.err (!%p2828_p3)
}
  0x34   : > { %s2832_s7 = scalar_lea.vmem %s3077_s10, 10240  ;;  %p2840_p12 = scmp.lt.s32.totalorder %s3077_s10, %s3077_s10 }
  0x35   : > { %p2833_p5 = scmp.ne.s32.totalorder %s3077_s10, %s2832_s7  ;;  %p2841_p0 = scmp.lt.s32.totalorder %s2832_s7, %s2832_s7 }
  0x37   : > { %p2835_p7 = pnand %p2833_p5, %p2793_p13  ;;  %p2842_p1 = por %p2841_p0, %p2840_p12 }
  0x39   : > { %p2836_p9 = pneg %p2835_p7 }
  0x3b   : > { %p2843_p4 = pnand %p2842_p1, %p2836_p9 }
  0x3d   : > { %2846 = shalt.err (!%p2843_p4)
}
  0x3e   : > { %s2969_s25 = smov 640   ;;  %s2970_s6 = smov 40  }
  0x3f   : > { %2653 = dma.hbm_to_vmem [thread:$0]  (!%p3073_p11), %s3916_s3, 10240, %s3077_s10, [#allocation7], %s2969_s25, %s2969_s25, %s2970_s6  }
  0x40   : > { %s34_s12 = sadd.s32 1, %s2959_s22  ;;  %s41_s13 = sadd.s32 1, %s2951_s20 }
  0x41   : > { %p36_p13 = scmp.ge.s32.totalorder %s34_s12, 2  ;;  %p48_p6 = scmp.ne.s32.totalorder %s2951_s20, %s2947_s19 }
  0x42   : > { %p49_p10 = scmp.eq.s32.totalorder %s2963_s23, 0  ;;  %p2664_p3 = scmp.lt.s32.totalorder %s2963_s23, 2 }
  0x43   : > { %s3942_s12 = smov (%p36_p13, %s34_s12), 0  ;;  %p3141_p7 = por %p3046_p2, %p48_p6 }
  0x44   : > { %p50_p5 = por %p49_p10, %p48_p6  ;;  %s38_s8 = ssub.s32 %s2959_s22, %s3942_s12 }
  0x45   : > { %s3929_s14 = scalar_select %p3141_p7, 1, 0 }
  0x46   : > { %s240_s15 = sand.u32 1, %s2951_s20   ;;  %p39_p9 = scmp.eq.s32.totalorder %s38_s8, 0 }
  0x47   : > { %s2164_s10 = sshll.u32 %s240_s15, 7  ;;  %s2177_s16 = sshll.u32 %s2959_s22, 11 }
  0x48   : > { %s3150_s17 = scalar_select %p39_p9, %s2951_s20, %s41_s13  }
  0x49   : > { %s3155_s25 = scalar_lea.hbm %s3913_s0, %s2177_s16  ;;  %s244_s27 = scalar_lea.vmem [#allocation3], %s2164_s10 }
  0x4a   : > { %s251_s6 = sshll.u32 %s244_s27, 4  ;;  %p3159_p2 = pnand %p2664_p3, %p50_p5  ;;  %s3163_s6 = int_to_ptr.vmem [resolvable:$true] %s251_s6 }
  0x4b   : > { %s3165_s11 = scalar_lea.sflag [#allocation4], %s240_s15  ;;  %s2847_s13 = scalar_lea.hbm %s3155_s25, 2048 }
  0x4c   : > { %p2848_p11 = scmp.ne.s32.totalorder %s3155_s25, %s2847_s13  ;;  %p2849_p12 = pneg %p3159_p2 }
  0x4d   : > { %s2852_s16 = scalar_lea.hbm %s3913_s0, 4096  ;;  %p2853_p4 = scmp.lt.u32.totalorder %s3155_s25, %s3913_s0 }
  0x4e   : > { %p2850_p0 = pnand %p2849_p12, %p2848_p11  ;;  %p2854_p13 = scmp.lt.u32.totalorder %s2852_s16, %s2847_s13 }
  0x4f   : > { %p2856_p10 = scmp.lt.u32.totalorder %s2847_s13, %s3155_s25 }
  0x50   : > { %p2851_p1 = pneg %p2850_p0  ;;  %p2855_p6 = por %p2854_p13, %p2853_p4 }
  0x52   : > { %p2857_p3 = por %p2856_p10, %p2855_p6 }
  0x54   : > { %p2858_p5 = pnand %p2857_p3, %p2851_p1 }
  0x56   : > { %2861 = shalt.err (!%p2858_p5)
}
  0x57   : > { %s2862_s15 = scalar_lea.vmem %s3163_s6, 2048  ;;  %s2971_s27 = smov [#allocation3]  }
  0x58   : > { %p2863_p9 = scmp.ne.s32.totalorder %s3163_s6, %s2862_s15  ;;  %s2867_s8 = sshll.u32 %s2971_s27, 4  ;;  %s2868_s8 = int_to_ptr.vmem [resolvable:$false] %s2867_s8 }
  0x59   : > { %s2869_s10 = scalar_lea.vmem %s2868_s8, 4096  ;;  %p2870_p7 = scmp.lt.s32.totalorder %s3163_s6, %s2868_s8 }
  0x5a   : > { %p2865_p11 = pnand %p2863_p9, %p2849_p12  ;;  %p2871_p4 = scmp.lt.s32.totalorder %s2869_s10, %s2862_s15 }
  0x5c   : > { %p2866_p0 = pneg %p2865_p11  ;;  %p2872_p13 = por %p2871_p4, %p2870_p7 }
  0x5e   : > { %p2873_p6 = pnand %p2872_p13, %p2866_p0 }
  0x60   : > { %2876 = shalt.err (!%p2873_p6)
}
  0x61   : > { %s2972_s13 = smov 128   ;;  %s2973_s16 = smov 8  }
  0x62   : > { %2657 = dma.hbm_to_vmem [thread:$0]  (!%p3159_p2), %s3155_s25, 2048, %s3163_s6, %s3165_s11, %s2972_s13, %s2972_s13, %s2973_s16  }
  0x63   : > { %263 = sbr.rel (%p3062_p8) target bundleno = 1088 (0x440), region = 40  ;;  %s3196_s24 = sand.u32 (!%p3062_p8), 1, %s2947_s19  }
  0x64   : > { %s2168_s7 = sshll.u32 (!%p3062_p8), %s3196_s24, 7  ;;  %s266_s15 = scalar_lea.sflag (!%p3062_p8), [#allocation4], %s3196_s24 }
  0x65   : > { %s3200_s27 = scalar_lea.vmem (!%p3062_p8), [#allocation3], %s2168_s7  ;;  %p3931_p7 = scmp.ne.s32.totalorder (!%p3062_p8), %s3925_s28, 0 }
  0x6a   : > { %2930 = dma.done.wait (%p3931_p7), %s266_s15, 2048  }
  0x6b   : > { %2932 = vsyncadd (%p3931_p7), %s266_s15, 4294965248  ;;  %p3932_p2 = scmp.ne.s32.totalorder %s3923_s26, 0 }
  0x6d   : > { %2934 = dma.done.wait (%p3932_p2), [#allocation7], 14336  }
  0x6e   : > { %2936 = vsyncadd (%p3932_p2), [#allocation7], 4294952960  ;;  %v2974_v0 = vmov 0.0   ;;  %v336_v1 = vld [vmem:[#allocation6 + $0x8] sm:$0xff]  ;;  %v338_v2 = vld [vmem:[#allocation6 + $0x18] sm:$0xff]  ;;  %s2171_s6 = sshll.u32 %s3196_s24, 9 }
  0x6f   : > { %443 = vmatprep.mubr.f32.mxu1 %v2974_v0  ;;  %952 = vmatprep.mubr.f32.mxu0 %v2974_v0  ;;  %v335_v3 = vld [vmem:[#allocation6] sm:$0xff]  ;;  %v2475_v4 = vpack.c.bf16 %v338_v2, %v336_v1  ;;  %v337_v5 = vld [vmem:[#allocation6 + $0x10] sm:$0xff]  ;;  %v340_v6 = vld [vmem:[#allocation6 + $0x28] sm:$0xff]  ;;  %s3704_s9 = scalar_lea.vmem [#allocation9], %s2171_s6  ;;  %s2178_s11 = sshll.u32 %s2955_s21, 13 }
  0x70   : > { %v342_v7 = vld [vmem:[#allocation6 + $0x38] sm:$0xff]  ;;  %v2477_v8 = vpack.c.bf16 %v337_v5, %v335_v3  ;;  %v339_v10 = vld [vmem:[#allocation6 + $0x20] sm:$0xff]  ;;  %v341_v11 = vld [vmem:[#allocation6 + $0x30] sm:$0xff]  ;;  %s2040_s8 = sshll.u32 %s3704_s9, 4  ;;  %s3860_s16 = scalar_lea.hbm %s3918_s5, %s2178_s11  ;;  %s3862_s8 = int_to_ptr.vmem [resolvable:$true] %s2040_s8 }
  0x71   : > { %v2479_v9 = vpack.c.bf16 %v342_v7, %v340_v6  ;;  %v344_v12 = vld [vmem:[#allocation6 + $0x48] sm:$0xff]  ;;  %2476 = vmatprep.subr.bf16.mxu1 %v2475_v4  ;;  %v346_v13 = vld [vmem:[#allocation6 + $0x58] sm:$0xff]  ;;  %v2481_v14 = vpack.c.bf16 %v341_v11, %v339_v10  ;;  %v343_v16 = vld [vmem:[#allocation6 + $0x40] sm:$0xff]  ;;  %s2024_s7 = scalar_lea.sflag [#allocation5], %s3196_s24  ;;  %s2877_s15 = scalar_lea.vmem %s3862_s8, 8192 }
  0x72   : > { %2478 = vmatpush1.bf16.msra.mxu1 %v2477_v8  ;;  %v2483_v15 = vpack.c.bf16 %v346_v13, %v344_v12  ;;  %v345_v17 = vld [vmem:[#allocation6 + $0x50] sm:$0xff]  ;;  %v348_v18 = vld [vmem:[#allocation6 + $0x68] sm:$0xff]  ;;  %v350_v19 = vld [vmem:[#allocation6 + $0x78] sm:$0xff]  ;;  %p2878_p8 = scmp.ne.s32.totalorder %s3862_s8, %s2877_s15  ;;  %p3933_p12 = scmp.ne.s32.totalorder %s3929_s14, 0 }
  0x73   : > { %2480 = vmatprep.subr.bf16.mxu1 %v2479_v9  ;;  %v2485_v20 = vpack.c.bf16 %v345_v17, %v343_v16  ;;  %v2487_v21 = vpack.c.bf16 %v350_v19, %v348_v18  ;;  %v347_v22 = vld [vmem:[#allocation6 + $0x60] sm:$0xff]  ;;  %v349_v23 = vld [vmem:[#allocation6 + $0x70] sm:$0xff]  ;;  %v352_v24 = vld [vmem:[#allocation6 + $0x88] sm:$0xff]  ;;  %s2975_s21 = smov [#allocation9]  }
  0x74   : > { %v354_v25 = vld [vmem:[#allocation6 + $0x98] sm:$0xff]  ;;  %v2489_v26 = vpack.c.bf16 %v349_v23, %v347_v22  ;;  %v351_v28 = vld [vmem:[#allocation6 + $0x80] sm:$0xff]  ;;  %v353_v29 = vld [vmem:[#allocation6 + $0x90] sm:$0xff]  ;;  %p2879_p1 = pnand %p2878_p8, %p3933_p12 }
  0x75   : > { %v2491_v27 = vpack.c.bf16 %v354_v25, %v352_v24  ;;  %v356_v30 = vld [vmem:[#allocation6 + $0xa8] sm:$0xff]  ;;  %v358_v31 = vld [vmem:[#allocation6 + $0xb8] sm:$0xff]  ;;  %v2493_v32 = vpack.c.bf16 %v353_v29, %v351_v28  ;;  %v355_v34 = vld [vmem:[#allocation6 + $0xa0] sm:$0xff] }
  0x76   : > { %2482 = vmatpush1.bf16.msra.mxu1 %v2481_v14  ;;  %v2495_v33 = vpack.c.bf16 %v358_v31, %v356_v30  ;;  %v357_v35 = vld [vmem:[#allocation6 + $0xb0] sm:$0xff]  ;;  %v360_v36 = vld [vmem:[#allocation6 + $0xc8] sm:$0xff]  ;;  %v362_v37 = vld [vmem:[#allocation6 + $0xd8] sm:$0xff]  ;;  %p2880_p10 = pneg %p2879_p1 }
  0x77   : > { %2484 = vmatprep.subr.bf16.mxu1 %v2483_v15  ;;  %v2497_v38 = vpack.c.bf16 %v357_v35, %v355_v34  ;;  %v2499_v39 = vpack.c.bf16 %v362_v37, %v360_v36  ;;  %v359_v40 = vld [vmem:[#allocation6 + $0xc0] sm:$0xff]  ;;  %v361_v41 = vld [vmem:[#allocation6 + $0xd0] sm:$0xff]  ;;  %v364_v42 = vld [vmem:[#allocation6 + $0xe8] sm:$0xff] }
  0x78   : > { %v366_v43 = vld [vmem:[#allocation6 + $0xf8] sm:$0xff]  ;;  %v628_v45 = vld [vmem:[#allocation8 + $0x40] sm:$0xff]  ;;  %v622_v46 = vld [vmem:[#allocation8 + $0x10] sm:$0xff]  ;;  %v2501_v48 = vpack.c.bf16 %v361_v41, %v359_v40 }
  0x79   : > { %v623_v44 = vld [vmem:[#allocation8 + $0x18] sm:$0xff]  ;;  %v633_v51 = vld [vmem:[#allocation8 + $0x68] sm:$0xff]  ;;  %v638_v52 = vld [vmem:[#allocation8 + $0x90] sm:$0xff]  ;;  %v2503_v54 = vpack.c.bf16 %v366_v43, %v364_v42 }
  0x7a   : > { %2486 = vmatpush1.bf16.msra.mxu1 %v2485_v20  ;;  %v627_v47 = vld [vmem:[#allocation8 + $0x38] sm:$0xff]  ;;  %v2539_v49 = vpack.c.bf16 %v628_v45, %v623_v44  ;;  %v632_v53 = vld [vmem:[#allocation8 + $0x60] sm:$0xff]  ;;  %v365_v56 = vld [vmem:[#allocation6 + $0xf0] sm:$0xff]  ;;  %v2543_v57 = vpack.c.bf16 %v638_v52, %v633_v51 }
  0x7b   : > { %2488 = vmatprep.subr.bf16.mxu1 %v2487_v21  ;;  %v2541_v50 = vpack.c.bf16 %v627_v47, %v622_v46  ;;  %v363_v55 = vld [vmem:[#allocation6 + $0xe0] sm:$0xff]  ;;  %v637_v58 = vld [vmem:[#allocation8 + $0x88] sm:$0xff]  ;;  %v626_v60 = vld [vmem:[#allocation8 + $0x30] sm:$0xff] }
  0x7c   : > { %v621_v59 = vld [vmem:[#allocation8 + $0x8] sm:$0xff]  ;;  %2540 = vmatprep.subr.bf16.mxu0 %v2539_v49  ;;  %v643_v61 = vld [vmem:[#allocation8 + $0xb8] sm:$0xff]  ;;  %v2545_v62 = vpack.c.bf16 %v637_v58, %v632_v53  ;;  %v648_v63 = vld [vmem:[#allocation8 + $0xe0] sm:$0xff]  ;;  %v2505_v1 = vpack.c.bf16 %v365_v56, %v363_v55 }
  0x7d   : > { %2542 = vmatpush1.bf16.msra.mxu0 %v2541_v50  ;;  %v2547_v2 = vpack.c.bf16 %v648_v63, %v643_v61  ;;  %v642_v3 = vld [vmem:[#allocation8 + $0xb0] sm:$0xff]  ;;  %v647_v4 = vld [vmem:[#allocation8 + $0xd8] sm:$0xff]  ;;  %v2507_v5 = vpack.c.bf16 %v626_v60, %v621_v59  ;;  %v620_v6 = vld [vmem:[#allocation8] sm:$0xff] }
  0x7e   : > { %2490 = vmatpush1.bf16.msra.mxu1 %v2489_v26  ;;  %2544 = vmatprep.subr.bf16.mxu0 %v2543_v57  ;;  %v625_v7 = vld [vmem:[#allocation8 + $0x28] sm:$0xff]  ;;  %v631_v8 = vld [vmem:[#allocation8 + $0x58] sm:$0xff]  ;;  %v636_v9 = vld [vmem:[#allocation8 + $0x80] sm:$0xff]  ;;  %v2549_v12 = vpack.c.bf16 %v647_v4, %v642_v3 }
  0x7f   : > { %2492 = vmatprep.subr.bf16.mxu1 %v2491_v27  ;;  %v653_v10 = vld [vmem:[#allocation8 + $0x108] sm:$0xff]  ;;  %v658_v11 = vld [vmem:[#allocation8 + $0x130] sm:$0xff]  ;;  %v319_v13 = vld [vmem:[%s3200_s27] sm:$0xff]  ;;  %v2509_v14 = vpack.c.bf16 %v625_v7, %v620_v6  ;;  %v2511_v17 = vpack.c.bf16 %v636_v9, %v631_v8 }
  0x80   : > { %v652_v15 = vld [vmem:[#allocation8 + $0x100] sm:$0xff]  ;;  %v657_v16 = vld [vmem:[#allocation8 + $0x128] sm:$0xff]  ;;  %v630_v18 = vld [vmem:[#allocation8 + $0x50] sm:$0xff]  ;;  %v2551_v21 = vpack.c.bf16 %v658_v11, %v653_v10 }
  0x81   : > { %2546 = vmatpush1.bf16.msra.mxu0 %v2545_v62  ;;  %v635_v19 = vld [vmem:[#allocation8 + $0x78] sm:$0xff]  ;;  %v641_v20 = vld [vmem:[#allocation8 + $0xa8] sm:$0xff]  ;;  %v646_v22 = vld [vmem:[#allocation8 + $0xd0] sm:$0xff]  ;;  %v2553_v25 = vpack.c.bf16 %v657_v16, %v652_v15 }
  0x82   : > { %2494 = vmatpush1.bf16.msra.mxu1 %v2493_v32  ;;  %2548 = vmatprep.subr.bf16.mxu0 %v2547_v2  ;;  %v663_v23 = vld [vmem:[#allocation8 + $0x158] sm:$0xff]  ;;  %v668_v24 = vld [vmem:[#allocation8 + $0x180] sm:$0xff]  ;;  %v320_v26 = vld [vmem:[%s3200_s27 + $0x8] sm:$0xff]  ;;  %v2513_v27 = vpack.c.bf16 %v635_v19, %v630_v18  ;;  %v2515_v30 = vpack.c.bf16 %v646_v22, %v641_v20 }
  0x83   : > { %2496 = vmatprep.subr.bf16.mxu1 %v2495_v33  ;;  %v662_v28 = vld [vmem:[#allocation8 + $0x150] sm:$0xff]  ;;  %v667_v29 = vld [vmem:[#allocation8 + $0x178] sm:$0xff]  ;;  %v640_v31 = vld [vmem:[#allocation8 + $0xa0] sm:$0xff]  ;;  %v2555_v33 = vpack.c.bf16 %v668_v24, %v663_v23 }
  0x84   : > { %v645_v32 = vld [vmem:[#allocation8 + $0xc8] sm:$0xff]  ;;  %v651_v34 = vld [vmem:[#allocation8 + $0xf8] sm:$0xff]  ;;  %v656_v35 = vld [vmem:[#allocation8 + $0x120] sm:$0xff]  ;;  %v2557_v36 = vpack.c.bf16 %v667_v29, %v662_v28 }
  0x85   : > { %2550 = vmatpush1.bf16.msra.mxu0 %v2549_v12  ;;  %v321_v37 = vld [vmem:[%s3200_s27 + $0x10] sm:$0xff]  ;;  %v655_v41 = vld [vmem:[#allocation8 + $0x118] sm:$0xff]  ;;  %v661_v42 = vld [vmem:[#allocation8 + $0x148] sm:$0xff] }
  0x86   : > { %2498 = vmatpush1.bf16.msra.mxu1 %v2497_v38  ;;  %2552 = vmatprep.subr.bf16.mxu0 %v2551_v21  ;;  %v2517_v38 = vpack.c.bf16 %v645_v32, %v640_v31  ;;  %v650_v40 = vld [vmem:[#allocation8 + $0xf0] sm:$0xff]  ;;  %v322_v44 = vld [vmem:[%s3200_s27 + $0x18] sm:$0xff]  ;;  %v660_v47 = vld [vmem:[#allocation8 + $0x140] sm:$0xff] }
  0x87   : > { %2500 = vmatprep.subr.bf16.mxu1 %v2499_v39  ;;  %v2519_v39 = vpack.c.bf16 %v656_v35, %v651_v34  ;;  %v666_v43 = vld [vmem:[#allocation8 + $0x170] sm:$0xff]  ;;  %v2521_v45 = vpack.c.bf16 %v655_v41, %v650_v40  ;;  %v671_v49 = vld [vmem:[#allocation8 + $0x198] sm:$0xff]  ;;  %v676_v50 = vld [vmem:[#allocation8 + $0x1c0] sm:$0xff] }
  0x88   : > { %v2523_v46 = vpack.c.bf16 %v666_v43, %v661_v42  ;;  %v323_v51 = vld [vmem:[%s3200_s27 + $0x20] sm:$0xff]  ;;  %v2527_v53 = vpack.c.bf16 %v676_v50, %v671_v49  ;;  %v675_v55 = vld [vmem:[#allocation8 + $0x1b8] sm:$0xff]  ;;  %v681_v56 = vld [vmem:[#allocation8 + $0x1e8] sm:$0xff] }
  0x89   : > { %2554 = vmatpush1.bf16.msra.mxu0 %v2553_v25  ;;  %v686_v57 = vld [vmem:[#allocation8 + $0x210] sm:$0xff]  ;;  %v324_v58 = vld [vmem:[%s3200_s27 + $0x28] sm:$0xff]  ;;  %v680_v61 = vld [vmem:[#allocation8 + $0x1e0] sm:$0xff] }
  0x8a   : > { %2502 = vmatpush1.bf16.msra.mxu1 %v2501_v48  ;;  %2556 = vmatprep.subr.bf16.mxu0 %v2555_v33  ;;  %v665_v48 = vld [vmem:[#allocation8 + $0x168] sm:$0xff]  ;;  %v2531_v60 = vpack.c.bf16 %v686_v57, %v681_v56  ;;  %v325_v63 = vld [vmem:[%s3200_s27 + $0x30] sm:$0xff]  ;;  %v326_v2 = vld [vmem:[%s3200_s27 + $0x38] sm:$0xff] }
  0x8b   : > { %2504 = vmatprep.subr.bf16.mxu1 %v2503_v54  ;;  %v2525_v52 = vpack.c.bf16 %v665_v48, %v660_v47  ;;  %v670_v54 = vld [vmem:[#allocation8 + $0x190] sm:$0xff]  ;;  %v685_v62 = vld [vmem:[#allocation8 + $0x208] sm:$0xff]  ;;  %v327_v3 = vld [vmem:[%s3200_s27 + $0x40] sm:$0xff] }
  0x8c   : > { %v2529_v59 = vpack.c.bf16 %v675_v55, %v670_v54  ;;  %v328_v4 = vld [vmem:[%s3200_s27 + $0x48] sm:$0xff]  ;;  %v330_v6 = vld [vmem:[%s3200_s27 + $0x58] sm:$0xff]  ;;  %v331_v7 = vld [vmem:[%s3200_s27 + $0x60] sm:$0xff] }
  0x8d   : > { %2558 = vmatpush1.bf16.msra.mxu0 %v2557_v36  ;;  %v332_v8 = vld [vmem:[%s3200_s27 + $0x68] sm:$0xff]  ;;  %v333_v9 = vld [vmem:[%s3200_s27 + $0x70] sm:$0xff]  ;;  %v334_v10 = vld [vmem:[%s3200_s27 + $0x78] sm:$0xff] }
  0x8e   : > { %2506 = vmatpush1.bf16.msra.mxu1 %v2505_v1  ;;  %v2533_v1 = vpack.c.bf16 %v685_v62, %v680_v61  ;;  %v673_v11 = vld [vmem:[#allocation8 + $0x1a8] sm:$0xff]  ;;  %v678_v12 = vld [vmem:[#allocation8 + $0x1d0] sm:$0xff]  ;;  %v688_v18 = vld [vmem:[#allocation8 + $0x220] sm:$0xff] }
  0x8f   : > { %2508 = vmatprep.subr.bf16.mxu1 %v2507_v5  ;;  %v329_v5 = vld [vmem:[%s3200_s27 + $0x50] sm:$0xff]  ;;  %v677_v15 = vld [vmem:[#allocation8 + $0x1c8] sm:$0xff]  ;;  %v687_v21 = vld [vmem:[#allocation8 + $0x218] sm:$0xff]  ;;  %s2881_s27 = sshll.u32 %s2975_s21, 4  ;;  %s2882_s27 = int_to_ptr.vmem [resolvable:$false] %s2881_s27 }
  0x90   : > { %v682_v20 = vld [vmem:[#allocation8 + $0x1f0] sm:$0xff]  ;;  %v691_v23 = vld [vmem:[#allocation8 + $0x238] sm:$0xff]  ;;  %v696_v24 = vld [vmem:[#allocation8 + $0x260] sm:$0xff]  ;;  %s2883_s26 = scalar_lea.vmem %s2882_s27, 16384  ;;  %p2884_p3 = scmp.lt.s32.totalorder %s3862_s8, %s2882_s27 }
  0x91   : > { %444 = vmatmul.mubr.f32.vlgmr.msra.gmra.mrb[0].mxu1 %v319_v13  ;;  %v2559_v13 = vpack.c.bf16 %v678_v12, %v673_v11  ;;  %v2565_v22 = vpack.c.bf16 %v687_v21, %v682_v20  ;;  %v693_v25 = vld [vmem:[#allocation8 + $0x248] sm:$0xff]  ;;  %v695_v28 = vld [vmem:[#allocation8 + $0x258] sm:$0xff]  ;;  %v698_v29 = vld [vmem:[#allocation8 + $0x270] sm:$0xff]  ;;  %p2885_p5 = scmp.lt.s32.totalorder %s2883_s26, %s2877_s15 }
  0x92   : > { %449 = vmatprep.mubr.f32.mxu1 %v2974_v0  ;;  %2510 = vmatpush1.bf16.msra.mxu1 %v2509_v14  ;;  %v672_v14 = vld [vmem:[#allocation8 + $0x1a0] sm:$0xff]  ;;  %v2567_v31 = vpack.c.bf16 %v698_v29, %v693_v25  ;;  %v697_v33 = vld [vmem:[#allocation8 + $0x268] sm:$0xff]  ;;  %v634_v56 = vld [vmem:[#allocation8 + $0x70] sm:$0xff] }
  0x93   : > { %2512 = vmatprep.subr.bf16.mxu1 %v2511_v17  ;;  %v2561_v16 = vpack.c.bf16 %v677_v15, %v672_v14  ;;  %2560 = vmatprep.subr.bf16.mxu0 %v2559_v13  ;;  %v683_v17 = vld [vmem:[#allocation8 + $0x1f8] sm:$0xff]  ;;  %v692_v32 = vld [vmem:[#allocation8 + $0x240] sm:$0xff]  ;;  %v629_v36 = vld [vmem:[#allocation8 + $0x48] sm:$0xff]  ;;  %p2886_p9 = por %p2885_p5, %p2884_p3 }
  0x94   : > { %v2563_v19 = vpack.c.bf16 %v688_v18, %v683_v17  ;;  %v2569_v34 = vpack.c.bf16 %v697_v33, %v692_v32  ;;  %v624_v35 = vld [vmem:[#allocation8 + $0x20] sm:$0xff]  ;;  %v639_v57 = vld [vmem:[#allocation8 + $0x98] sm:$0xff]  ;;  %v654_v12 = vld [vmem:[#allocation8 + $0x110] sm:$0xff] }
  0x95   : > { %450 = vmatmul.mubr.f32.gmra.mrb[2].mxu1 %v320_v26  ;;  %2562 = vmatpush1.bf16.msra.mxu0 %v2561_v16  ;;  %v2535_v26 = vpack.c.bf16 %v696_v24, %v691_v23  ;;  %v367_v41 = vld [vmem:[%s3915_s2] sm:$0x3]  ;;  %v659_v13 = vld [vmem:[#allocation8 + $0x138] sm:$0xff]  ;;  %p2887_p11 = pnand %p2886_p9, %p2880_p10 }
  0x96   : > { %455 = vmatprep.mubr.f32.mxu1 %v2974_v0  ;;  %2514 = vmatpush1.bf16.msra.mxu1 %v2513_v27  ;;  %v690_v27 = vld [vmem:[#allocation8 + $0x230] sm:$0xff]  ;;  %v664_v21 = vld [vmem:[#allocation8 + $0x160] sm:$0xff]  ;;  %v679_v32 = vld [vmem:[#allocation8 + $0x1d8] sm:$0xff] }
  0x97   : > { %2516 = vmatprep.subr.bf16.mxu1 %v2515_v30  ;;  %2564 = vmatprep.subr.bf16.mxu0 %v2563_v19  ;;  %v2537_v30 = vpack.c.bf16 %v695_v28, %v690_v27  ;;  %v2583_v19 = vpack.c.bf16 %v659_v13, %v654_v12 }
  0x99   : > { %456 = vmatmul.mubr.f32.gmra.mrb[4].mxu1 %v321_v37  ;;  %2566 = vmatpush1.bf16.msra.mxu0 %v2565_v22  ;;  %v2571_v37 = vpack.c.bf16 %v629_v36, %v624_v35  ;;  %v669_v22 = vld [vmem:[#allocation8 + $0x188] sm:$0xff] }
  0x9a   : > { %461 = vmatprep.mubr.f32.mxu1 %v2974_v0  ;;  %2518 = vmatpush1.bf16.msra.mxu1 %v2517_v38  ;;  %v369_v38 = vlaneseq  ;;  %v2587_v28 = vpack.c.bf16 %v669_v22, %v664_v21 }
  0x9b   : > { %2520 = vmatprep.subr.bf16.mxu1 %v2519_v39  ;;  %2568 = vmatprep.subr.bf16.mxu0 %v2567_v31  ;;  %v674_v31 = vld [vmem:[#allocation8 + $0x1b0] sm:$0xff] }
  0x9c   : > { %v3244_v39 = vshrl.u32 %v369_v38, 7  ;;  %v2591_v38 = vpack.c.bf16 %v679_v32, %v674_v31 }
  0x9d   : > { %462 = vmatmul.mubr.f32.gmra.mrb[6].mxu1 %v322_v44  ;;  %2570 = vmatpush1.bf16.msra.mxu0 %v2569_v34 }
  0x9e   : > { %467 = vmatprep.mubr.f32.mxu1 %v2974_v0  ;;  %2522 = vmatpush1.bf16.msra.mxu1 %v2521_v45  ;;  %v3247_v40 = vsub.s32 0, %v3244_v39  ;;  %v3253_v42 = vsub.s32 1, %v3244_v39 }
  0x9f   : > { %2524 = vmatprep.subr.bf16.mxu1 %v2523_v46 }
  0xa0   : > { %v3256_v43 = vrot.slane %v367_v41, %v3247_v40  ;;  %v3259_v44 = vrot.slane %v367_v41, %v3253_v42 }
  0xa1   : > { %468 = vmatmul.mubr.f32.gmra.mrb[8].mxu1 %v323_v51 }
  0xa2   : > { %473 = vmatprep.mubr.f32.mxu1 %v2974_v0  ;;  %2526 = vmatpush1.bf16.msra.mxu1 %v2525_v52 }
  0xa3   : > { %2528 = vmatprep.subr.bf16.mxu1 %v2527_v53 }
  0xa5   : > { %474 = vmatmul.mubr.f32.gmra.mrb[10].mxu1 %v324_v58 }
  0xa6   : > { %479 = vmatprep.mubr.f32.mxu1 %v2974_v0  ;;  %2530 = vmatpush1.bf16.msra.mxu1 %v2529_v59 }
  0xa7   : > { %2532 = vmatprep.subr.bf16.mxu1 %v2531_v60  ;;  %v2575_v60 = vpack.c.bf16 %v639_v57, %v634_v56  ;;  %v699_v56 = vld [vmem:[#allocation8 + $0x278] sm:$0xff] }
  0xa9   : > { %480 = vmatmul.mubr.f32.gmra.mrb[12].mxu1 %v325_v63 }
  0xaa   : > { %485 = vmatprep.mubr.f32.mxu1 %v2974_v0  ;;  %2534 = vmatpush1.bf16.msra.mxu1 %v2533_v1 }
  0xab   : > { %2536 = vmatprep.subr.bf16.mxu1 %v2535_v26 }
  0xad   : > { %486 = vmatmul.mubr.f32.gmra.mrb[14].mxu1 %v326_v2  ;;  %v644_v2 = vld [vmem:[#allocation8 + $0xc0] sm:$0xff] }
  0xae   : > { %491 = vmatprep.mubr.f32.mxu1 %v2974_v0  ;;  %2538 = vmatpush1.bf16.msra.mxu1 %v2537_v30 }
  0xaf   : > { %2572 = vmatprep.subr.bf16.mxu1 %v2571_v37 }
  0xb1   : > { %492 = vmatmul.mubr.f32.gmra.mrb[16].mxu1 %v327_v3  ;;  %v649_v3 = vld [vmem:[#allocation8 + $0xe8] sm:$0xff] }
  0xb2   : > { %497 = vmatprep.mubr.f32.mxu1 %v2974_v0 }
  0xb5   : > { %498 = vmatmul.mubr.f32.gmra.mrb[18].mxu1 %v328_v4 }
  0xb6   : > { %503 = vmatprep.mubr.f32.mxu1 %v2974_v0 }
  0xb9   : > { %504 = vmatmul.mubr.f32.gmra.mrb[20].mxu1 %v329_v5 }
  0xba   : > { %509 = vmatprep.mubr.f32.mxu1 %v2974_v0 }
  0xbd   : > { %510 = vmatmul.mubr.f32.gmra.mrb[22].mxu1 %v330_v6 }
  0xbe   : > { %515 = vmatprep.mubr.f32.mxu1 %v2974_v0 }
  0xc1   : > { %516 = vmatmul.mubr.f32.gmra.mrb[24].mxu1 %v331_v7 }
  0xc2   : > { %521 = vmatprep.mubr.f32.mxu1 %v2974_v0 }
  0xc5   : > { %522 = vmatmul.mubr.f32.gmra.mrb[26].mxu1 %v332_v8 }
  0xc6   : > { %527 = vmatprep.mubr.f32.mxu1 %v2974_v0 }
  0xc9   : > { %528 = vmatmul.mubr.f32.gmra.mrb[28].mxu1 %v333_v9  ;;  %v2579_v9 = vpack.c.bf16 %v649_v3, %v644_v2 }
  0xca   : > { %533 = vmatprep.mubr.f32.mxu1 %v2974_v0 }
  0xcd   : > { %534 = vmatmul.mubr.f32.gmra.mrb[30].mxu1 %v334_v10 }
  0xce   : > { %791 = vmatprep.mubr.f32.mxu1 %v2974_v0 }
 0x164   : > { %v445_v45 = vpop.f32.mrb[0].mxu1 }
 0x165   : > { %v446_v46 = vadd.f32 %v445_v45, %v3256_v43  ;;  %v447_v47 = vpop.f32.mrb[1].mxu1  ;;  %v684_v45 = vld [vmem:[#allocation8 + $0x200] sm:$0xff] }
 0x166   : > { %v448_v48 = vadd.f32 %v447_v47, %v3259_v44 }
 0x167   : > { %2727 = vtanh.f32 %v446_v46  ;;  %v689_v46 = vld [vmem:[#allocation8 + $0x228] sm:$0xff] }
 0x168   : > { %v451_v49 = vpop.f32.mrb[2].mxu1  ;;  %2729 = vtanh.f32 %v448_v48 }
 0x169   : > { %v452_v50 = vadd.f32 %v451_v49, %v3256_v43  ;;  %v453_v51 = vpop.f32.mrb[3].mxu1 }
 0x16a   : > { %v454_v52 = vadd.f32 %v453_v51, %v3259_v44 }
 0x16b   : > { %2731 = vtanh.f32 %v452_v50 }
 0x16c   : > { %2733 = vtanh.f32 %v454_v52  ;;  %v457_v53 = vpop.f32.mrb[4].mxu1  ;;  %v2595_v52 = vpack.c.bf16 %v689_v46, %v684_v45 }
 0x16d   : > { %v458_v54 = vadd.f32 %v457_v53, %v3256_v43  ;;  %v459_v55 = vpop.f32.mrb[5].mxu1 }
 0x16e   : > { %v460_v58 = vadd.f32 %v459_v55, %v3259_v44  ;;  %v694_v55 = vld [vmem:[#allocation8 + $0x250] sm:$0xff] }
 0x16f   : > { %2735 = vtanh.f32 %v458_v54 }
 0x170   : > { %v463_v59 = vpop.f32.mrb[6].mxu1  ;;  %2737 = vtanh.f32 %v460_v58 }
 0x171   : > { %v3267_v61 = vpop.eup %2727  ;;  %v464_v62 = vadd.f32 %v463_v59, %v3256_v43  ;;  %v465_v63 = vpop.f32.mrb[7].mxu1 }
 0x172   : > { %v466_v1 = vadd.f32 %v465_v63, %v3259_v44  ;;  %792 = vmatmul.mubr.f32.vlgmr.msra.gmra.mrb[32].mxu1 %v3267_v61  ;;  %953 = vmatmul.mubr.f32.vlgmr.msra.gmra.mrb[0].mxu0 %v3267_v61  ;;  %v2730_v4 = vpop.eup %2729  ;;  %v2599_v63 = vpack.c.bf16 %v699_v56, %v694_v55 }
 0x173   : > { %2739 = vtanh.f32 %v464_v62  ;;  %2574 = vmatpush3.bf16.msra.mxu1 %v2571_v37  ;;  %797 = vmatprep.mubr.f32.mxu1 %v2974_v0 }
 0x174   : > { %2741 = vtanh.f32 %v466_v1  ;;  %v469_v5 = vpop.f32.mrb[8].mxu1  ;;  %958 = vmatprep.mubr.f32.mxu0 %v2974_v0  ;;  %2576 = vmatprep.subr.bf16.mxu1 %v2575_v60 }
 0x175   : > { %v3275_v6 = vpop.eup %2731  ;;  %v470_v7 = vadd.f32 %v469_v5, %v3256_v43  ;;  %v471_v8 = vpop.f32.mrb[9].mxu1 }
 0x176   : > { %v2734_v10 = vpop.eup %2733  ;;  %v472_v11 = vadd.f32 %v471_v8, %v3259_v44  ;;  %798 = vmatmul.mubr.f32.gmra.mrb[34].mxu1 %v3275_v6  ;;  %959 = vmatmul.mubr.f32.gmra.mrb[2].mxu0 %v3275_v6 }
 0x177   : > { %2743 = vtanh.f32 %v470_v7  ;;  %803 = vmatprep.mubr.f32.mxu1 %v2974_v0  ;;  %964 = vmatprep.mubr.f32.mxu0 %v2974_v0  ;;  %v2603_v14 = vpack.c.bf16 %v2734_v10, %v2730_v4 }
 0x178   : > { %v475_v15 = vpop.f32.mrb[10].mxu1  ;;  %2578 = vmatpush3.bf16.msra.mxu1 %v2575_v60  ;;  %2745 = vtanh.f32 %v472_v11 }
 0x179   : > { %v3283_v16 = vpop.eup %2735  ;;  %v476_v17 = vadd.f32 %v475_v15, %v3256_v43  ;;  %v477_v18 = vpop.f32.mrb[11].mxu1  ;;  %2604 = vmatprep.subr.bf16.mxu0 %v2603_v14  ;;  %2580 = vmatprep.subr.bf16.mxu1 %v2579_v9 }
 0x17a   : > { %v478_v20 = vadd.f32 %v477_v18, %v3259_v44  ;;  %804 = vmatmul.mubr.f32.gmra.mrb[36].mxu1 %v3283_v16  ;;  %965 = vmatmul.mubr.f32.gmra.mrb[4].mxu0 %v3283_v16  ;;  %v2738_v23 = vpop.eup %2737 }
 0x17b   : > { %2747 = vtanh.f32 %v476_v17  ;;  %2606 = vmatpush3.bf16.xpose.msra.mxu0 %v2603_v14  ;;  %809 = vmatprep.mubr.f32.mxu1 %v2974_v0 }
 0x17c   : > { %2749 = vtanh.f32 %v478_v20  ;;  %v481_v24 = vpop.f32.mrb[12].mxu1  ;;  %970 = vmatprep.mubr.f32.mxu0 %v2974_v0  ;;  %2582 = vmatpush3.bf16.msra.mxu1 %v2579_v9 }
 0x17d   : > { %v3291_v25 = vpop.eup %2739  ;;  %v482_v26 = vadd.f32 %v481_v24, %v3256_v43  ;;  %v483_v27 = vpop.f32.mrb[13].mxu1  ;;  %2584 = vmatprep.subr.bf16.mxu1 %v2583_v19 }
 0x17e   : > { %v2742_v29 = vpop.eup %2741  ;;  %v484_v30 = vadd.f32 %v483_v27, %v3259_v44  ;;  %810 = vmatmul.mubr.f32.gmra.mrb[38].mxu1 %v3291_v25  ;;  %971 = vmatmul.mubr.f32.gmra.mrb[6].mxu0 %v3291_v25 }
 0x17f   : > { %2751 = vtanh.f32 %v482_v26  ;;  %815 = vmatprep.mubr.f32.mxu1 %v2974_v0  ;;  %976 = vmatprep.mubr.f32.mxu0 %v2974_v0  ;;  %v2607_v33 = vpack.c.bf16 %v2742_v29, %v2738_v23 }
 0x180   : > { %v487_v34 = vpop.f32.mrb[14].mxu1  ;;  %2586 = vmatpush3.bf16.msra.mxu1 %v2583_v19  ;;  %2753 = vtanh.f32 %v484_v30 }
 0x181   : > { %v3299_v35 = vpop.eup %2743  ;;  %v488_v36 = vadd.f32 %v487_v34, %v3256_v43  ;;  %v489_v37 = vpop.f32.mrb[15].mxu1  ;;  %2608 = vmatprep.subr.bf16.mxu0 %v2607_v33  ;;  %2588 = vmatprep.subr.bf16.mxu1 %v2587_v28 }
 0x182   : > { %v490_v41 = vadd.f32 %v489_v37, %v3259_v44  ;;  %816 = vmatmul.mubr.f32.gmra.mrb[40].mxu1 %v3299_v35  ;;  %977 = vmatmul.mubr.f32.gmra.mrb[8].mxu0 %v3299_v35  ;;  %v2746_v47 = vpop.eup %2745 }
 0x183   : > { %2755 = vtanh.f32 %v488_v36  ;;  %2610 = vmatpush3.bf16.xpose.msra.mxu0 %v2607_v33  ;;  %821 = vmatprep.mubr.f32.mxu1 %v2974_v0 }
 0x184   : > { %2757 = vtanh.f32 %v490_v41  ;;  %v493_v48 = vpop.f32.mrb[16].mxu1  ;;  %982 = vmatprep.mubr.f32.mxu0 %v2974_v0  ;;  %2590 = vmatpush3.bf16.msra.mxu1 %v2587_v28 }
 0x185   : > { %v3307_v49 = vpop.eup %2747  ;;  %v494_v50 = vadd.f32 %v493_v48, %v3256_v43  ;;  %v495_v51 = vpop.f32.mrb[17].mxu1  ;;  %2592 = vmatprep.subr.bf16.mxu1 %v2591_v38 }
 0x186   : > { %v2750_v53 = vpop.eup %2749  ;;  %v496_v54 = vadd.f32 %v495_v51, %v3259_v44  ;;  %822 = vmatmul.mubr.f32.gmra.mrb[42].mxu1 %v3307_v49  ;;  %983 = vmatmul.mubr.f32.gmra.mrb[10].mxu0 %v3307_v49 }
 0x187   : > { %2759 = vtanh.f32 %v494_v50  ;;  %827 = vmatprep.mubr.f32.mxu1 %v2974_v0  ;;  %988 = vmatprep.mubr.f32.mxu0 %v2974_v0  ;;  %v2611_v57 = vpack.c.bf16 %v2750_v53, %v2746_v47 }
 0x188   : > { %v499_v58 = vpop.f32.mrb[18].mxu1  ;;  %2594 = vmatpush3.bf16.msra.mxu1 %v2591_v38  ;;  %2761 = vtanh.f32 %v496_v54 }
 0x189   : > { %v3315_v59 = vpop.eup %2751  ;;  %v500_v60 = vadd.f32 %v499_v58, %v3256_v43  ;;  %v501_v62 = vpop.f32.mrb[19].mxu1  ;;  %2612 = vmatprep.subr.bf16.mxu0 %v2611_v57  ;;  %2596 = vmatprep.subr.bf16.mxu1 %v2595_v52 }
 0x18a   : > { %v502_v1 = vadd.f32 %v501_v62, %v3259_v44  ;;  %828 = vmatmul.mubr.f32.gmra.mrb[44].mxu1 %v3315_v59  ;;  %989 = vmatmul.mubr.f32.gmra.mrb[12].mxu0 %v3315_v59  ;;  %v2754_v2 = vpop.eup %2753 }
 0x18b   : > { %2763 = vtanh.f32 %v500_v60  ;;  %2614 = vmatpush3.bf16.xpose.msra.mxu0 %v2611_v57  ;;  %833 = vmatprep.mubr.f32.mxu1 %v2974_v0 }
 0x18c   : > { %2765 = vtanh.f32 %v502_v1  ;;  %v505_v3 = vpop.f32.mrb[20].mxu1  ;;  %994 = vmatprep.mubr.f32.mxu0 %v2974_v0  ;;  %2598 = vmatpush3.bf16.msra.mxu1 %v2595_v52 }
 0x18d   : > { %v3323_v4 = vpop.eup %2755  ;;  %v506_v5 = vadd.f32 %v505_v3, %v3256_v43  ;;  %v507_v7 = vpop.f32.mrb[21].mxu1  ;;  %2600 = vmatprep.subr.bf16.mxu1 %v2599_v63 }
 0x18e   : > { %v2758_v8 = vpop.eup %2757  ;;  %v508_v9 = vadd.f32 %v507_v7, %v3259_v44  ;;  %834 = vmatmul.mubr.f32.gmra.mrb[46].mxu1 %v3323_v4  ;;  %995 = vmatmul.mubr.f32.gmra.mrb[14].mxu0 %v3323_v4 }
 0x18f   : > { %2767 = vtanh.f32 %v506_v5  ;;  %839 = vmatprep.mubr.f32.mxu1 %v2974_v0  ;;  %1000 = vmatprep.mubr.f32.mxu0 %v2974_v0  ;;  %v2615_v10 = vpack.c.bf16 %v2758_v8, %v2754_v2 }
 0x190   : > { %v511_v11 = vpop.f32.mrb[22].mxu1  ;;  %2602 = vmatpush3.bf16.msra.mxu1 %v2599_v63  ;;  %2769 = vtanh.f32 %v508_v9 }
 0x191   : > { %v3331_v12 = vpop.eup %2759  ;;  %v512_v13 = vadd.f32 %v511_v11, %v3256_v43  ;;  %v513_v14 = vpop.f32.mrb[23].mxu1  ;;  %2616 = vmatprep.subr.bf16.mxu0 %v2615_v10 }
 0x192   : > { %v514_v15 = vadd.f32 %v513_v14, %v3259_v44  ;;  %840 = vmatmul.mubr.f32.gmra.mrb[48].mxu1 %v3331_v12  ;;  %1001 = vmatmul.mubr.f32.gmra.mrb[16].mxu0 %v3331_v12  ;;  %v2762_v17 = vpop.eup %2761 }
 0x193   : > { %2771 = vtanh.f32 %v512_v13  ;;  %2618 = vmatpush3.bf16.xpose.msra.mxu0 %v2615_v10  ;;  %845 = vmatprep.mubr.f32.mxu1 %v2974_v0 }
 0x194   : > { %2773 = vtanh.f32 %v514_v15  ;;  %v517_v18 = vpop.f32.mrb[24].mxu1  ;;  %1006 = vmatprep.mubr.f32.mxu0 %v2974_v0 }
 0x195   : > { %v3339_v19 = vpop.eup %2763  ;;  %v518_v20 = vadd.f32 %v517_v18, %v3256_v43  ;;  %v519_v21 = vpop.f32.mrb[25].mxu1 }
 0x196   : > { %v2766_v22 = vpop.eup %2765  ;;  %v520_v23 = vadd.f32 %v519_v21, %v3259_v44  ;;  %846 = vmatmul.mubr.f32.gmra.mrb[50].mxu1 %v3339_v19  ;;  %1007 = vmatmul.mubr.f32.gmra.mrb[18].mxu0 %v3339_v19 }
 0x197   : > { %2775 = vtanh.f32 %v518_v20  ;;  %851 = vmatprep.mubr.f32.mxu1 %v2974_v0  ;;  %1012 = vmatprep.mubr.f32.mxu0 %v2974_v0  ;;  %v2619_v24 = vpack.c.bf16 %v2766_v22, %v2762_v17 }
 0x198   : > { %v523_v26 = vpop.f32.mrb[26].mxu1  ;;  %2777 = vtanh.f32 %v520_v23 }
 0x199   : > { %v3347_v27 = vpop.eup %2767  ;;  %v524_v28 = vadd.f32 %v523_v26, %v3256_v43  ;;  %v525_v29 = vpop.f32.mrb[27].mxu1  ;;  %2620 = vmatprep.subr.bf16.mxu0 %v2619_v24 }
 0x19a   : > { %v526_v30 = vadd.f32 %v525_v29, %v3259_v44  ;;  %852 = vmatmul.mubr.f32.gmra.mrb[52].mxu1 %v3347_v27  ;;  %1013 = vmatmul.mubr.f32.gmra.mrb[20].mxu0 %v3347_v27  ;;  %v2770_v31 = vpop.eup %2769 }
 0x19b   : > { %2779 = vtanh.f32 %v524_v28  ;;  %2622 = vmatpush3.bf16.xpose.msra.mxu0 %v2619_v24  ;;  %857 = vmatprep.mubr.f32.mxu1 %v2974_v0 }
 0x19c   : > { %2781 = vtanh.f32 %v526_v30  ;;  %v529_v32 = vpop.f32.mrb[28].mxu1  ;;  %1018 = vmatprep.mubr.f32.mxu0 %v2974_v0 }
 0x19d   : > { %v2772_v33 = vpop.eup %2771  ;;  %v530_v34 = vadd.f32 %v529_v32, %v3256_v43  ;;  %v531_v36 = vpop.f32.mrb[29].mxu1 }
 0x19e   : > { %v2774_v37 = vpop.eup %2773  ;;  %v532_v38 = vadd.f32 %v531_v36, %v3259_v44  ;;  %858 = vmatmul.mubr.f32.gmra.mrb[54].mxu1 %v2772_v33  ;;  %1019 = vmatmul.mubr.f32.gmra.mrb[22].mxu0 %v2772_v33 }
 0x19f   : > { %2783 = vtanh.f32 %v530_v34  ;;  %863 = vmatprep.mubr.f32.mxu1 %v2974_v0  ;;  %1024 = vmatprep.mubr.f32.mxu0 %v2974_v0  ;;  %v2623_v41 = vpack.c.bf16 %v2774_v37, %v2770_v31 }
 0x1a0   : > { %v535_v45 = vpop.f32.mrb[30].mxu1  ;;  %2785 = vtanh.f32 %v532_v38 }
 0x1a1   : > { %v2776_v46 = vpop.eup %2775  ;;  %v536_v47 = vadd.f32 %v535_v45, %v3256_v43  ;;  %v537_v48 = vpop.f32.mrb[31].mxu1  ;;  %2624 = vmatprep.subr.bf16.mxu0 %v2623_v41 }
 0x1a2   : > { %v538_v50 = vadd.f32 %v537_v48, %v3259_v44  ;;  %864 = vmatmul.mubr.f32.gmra.mrb[56].mxu1 %v2776_v46  ;;  %1025 = vmatmul.mubr.f32.gmra.mrb[24].mxu0 %v2776_v46  ;;  %v2778_v51 = vpop.eup %2777 }
 0x1a3   : > { %2787 = vtanh.f32 %v536_v47  ;;  %2626 = vmatpush3.bf16.xpose.msra.mxu0 %v2623_v41  ;;  %869 = vmatprep.mubr.f32.mxu1 %v2974_v0 }
 0x1a4   : > { %2789 = vtanh.f32 %v538_v50  ;;  %1030 = vmatprep.mubr.f32.mxu0 %v2974_v0 }
 0x1a5   : > { %v2780_v52 = vpop.eup %2779 }
 0x1a6   : > { %v2782_v53 = vpop.eup %2781  ;;  %870 = vmatmul.mubr.f32.gmra.mrb[58].mxu1 %v2780_v52  ;;  %1031 = vmatmul.mubr.f32.gmra.mrb[26].mxu0 %v2780_v52 }
 0x1a7   : > { %875 = vmatprep.mubr.f32.mxu1 %v2974_v0  ;;  %1036 = vmatprep.mubr.f32.mxu0 %v2974_v0  ;;  %v2627_v43 = vpack.c.bf16 %v2782_v53, %v2778_v51 }
 0x1a9   : > { %v2784_v44 = vpop.eup %2783  ;;  %2628 = vmatprep.subr.bf16.mxu0 %v2627_v43 }
 0x1aa   : > { %876 = vmatmul.mubr.f32.gmra.mrb[60].mxu1 %v2784_v44  ;;  %1037 = vmatmul.mubr.f32.gmra.mrb[28].mxu0 %v2784_v44  ;;  %v2786_v54 = vpop.eup %2785 }
 0x1ab   : > { %2630 = vmatpush3.bf16.xpose.msra.mxu0 %v2627_v43  ;;  %881 = vmatprep.mubr.f32.mxu1 %v2974_v0 }
 0x1ac   : > { %1042 = vmatprep.mubr.f32.mxu0 %v2974_v0  ;;  %v3381_v0 = vld [vmem:[%s3917_s4] sm:$0x1f] }
 0x1ad   : > { %v2788_v55 = vpop.eup %2787 }
 0x1ae   : > { %v2790_v56 = vpop.eup %2789  ;;  %882 = vmatmul.mubr.f32.gmra.mrb[62].mxu1 %v2788_v55  ;;  %1043 = vmatmul.mubr.f32.gmra.mrb[30].mxu0 %v2788_v55 }
 0x1af   : > { %2323 = vmatprep.mubr.f32.mxu1 %v3267_v61  ;;  %v2631_v57 = vpack.c.bf16 %v2790_v56, %v2786_v54  ;;  %v3385_v61 = vrot.slane %v3381_v0, %v3247_v40 }
 0x1b1   : > { %2632 = vmatprep.subr.bf16.mxu0 %v2631_v57 }
 0x1b2   : > { %2324 = vmatmul.mubr.f32.vlgmr.msra.gmra.mrb[64].mxu1 %v3275_v6 }
 0x1b3   : > { %2634 = vmatpush3.bf16.xpose.msra.mxu0 %v2631_v57  ;;  %2326 = vmatprep.mubr.f32.mxu1 %v3283_v16 }
 0x1b6   : > { %2327 = vmatmul.mubr.f32.gmra.mrb[66].mxu1 %v3291_v25 }
 0x1b7   : > { %2329 = vmatprep.mubr.f32.mxu1 %v3299_v35 }
 0x1ba   : > { %2330 = vmatmul.mubr.f32.gmra.mrb[68].mxu1 %v3307_v49 }
 0x1bb   : > { %2332 = vmatprep.mubr.f32.mxu1 %v3315_v59 }
 0x1be   : > { %2333 = vmatmul.mubr.f32.gmra.mrb[70].mxu1 %v3323_v4 }
 0x1bf   : > { %2335 = vmatprep.mubr.f32.mxu1 %v3331_v12 }
 0x1c2   : > { %2336 = vmatmul.mubr.f32.gmra.mrb[72].mxu1 %v3339_v19 }
 0x1c3   : > { %2338 = vmatprep.mubr.f32.mxu1 %v3347_v27 }
 0x1c6   : > { %2339 = vmatmul.mubr.f32.gmra.mrb[74].mxu1 %v2772_v33 }
 0x1c7   : > { %2341 = vmatprep.mubr.f32.mxu1 %v2776_v46 }
 0x1ca   : > { %2342 = vmatmul.mubr.f32.gmra.mrb[76].mxu1 %v2780_v52 }
 0x1cb   : > { %2344 = vmatprep.mubr.f32.mxu1 %v2784_v44 }
 0x1ce   : > { %2345 = vmatmul.mubr.f32.gmra.mrb[78].mxu1 %v2788_v55 }
 0x245   : > { %v793_v6 = vpop.f32.mrb[32].mxu1  ;;  %v3387_v16 = vpop.f32.mrb[0].mxu0 }
 0x246   : > { %v794_v25 = vadd.f32 %v793_v6, %v3385_v61  ;;  %v3390_v35 = vpop.f32.mrb[33].mxu1  ;;  %v3392_v49 = vpop.f32.mrb[1].mxu0 }
 0x248   : > { %2379 = vmatprep.mubr.f32.mxu0 %v794_v25 }
 0x249   : > { %v799_v58 = vpop.f32.mrb[34].mxu1  ;;  %v3394_v59 = vpop.f32.mrb[2].mxu0 }
 0x24a   : > { %v800_v60 = vadd.f32 %v799_v58, %v3385_v61  ;;  %v3397_v62 = vpop.f32.mrb[35].mxu1  ;;  %v3399_v63 = vpop.f32.mrb[3].mxu0 }
 0x24c   : > { %2380 = vmatmul.mubr.f32.vlgmr.msra.gmra.mrb[32].mxu0 %v800_v60 }
 0x24d   : > { %v805_v1 = vpop.f32.mrb[36].mxu1  ;;  %v3401_v2 = vpop.f32.mrb[4].mxu0 }
 0x24e   : > { %v806_v3 = vadd.f32 %v805_v1, %v3385_v61  ;;  %v3404_v4 = vpop.f32.mrb[37].mxu1  ;;  %v3406_v5 = vpop.f32.mrb[5].mxu0 }
 0x250   : > { %2382 = vmatprep.mubr.f32.mxu0 %v806_v3 }
 0x251   : > { %v811_v7 = vpop.f32.mrb[38].mxu1  ;;  %v3408_v8 = vpop.f32.mrb[6].mxu0 }
 0x252   : > { %v812_v9 = vadd.f32 %v811_v7, %v3385_v61  ;;  %v3411_v10 = vpop.f32.mrb[39].mxu1  ;;  %v3413_v11 = vpop.f32.mrb[7].mxu0 }
 0x254   : > { %2383 = vmatmul.mubr.f32.gmra.mrb[34].mxu0 %v812_v9 }
 0x255   : > { %v817_v12 = vpop.f32.mrb[40].mxu1  ;;  %v3415_v13 = vpop.f32.mrb[8].mxu0 }
 0x256   : > { %v818_v14 = vadd.f32 %v817_v12, %v3385_v61  ;;  %v3418_v15 = vpop.f32.mrb[41].mxu1  ;;  %v3420_v17 = vpop.f32.mrb[9].mxu0 }
 0x258   : > { %2385 = vmatprep.mubr.f32.mxu0 %v818_v14 }
 0x259   : > { %v823_v18 = vpop.f32.mrb[42].mxu1  ;;  %v3422_v19 = vpop.f32.mrb[10].mxu0 }
 0x25a   : > { %v824_v20 = vadd.f32 %v823_v18, %v3385_v61  ;;  %v3425_v21 = vpop.f32.mrb[43].mxu1  ;;  %v3427_v22 = vpop.f32.mrb[11].mxu0 }
 0x25c   : > { %2386 = vmatmul.mubr.f32.gmra.mrb[36].mxu0 %v824_v20 }
 0x25d   : > { %v829_v23 = vpop.f32.mrb[44].mxu1  ;;  %v3429_v24 = vpop.f32.mrb[12].mxu0 }
 0x25e   : > { %v830_v26 = vadd.f32 %v829_v23, %v3385_v61  ;;  %v3432_v27 = vpop.f32.mrb[45].mxu1  ;;  %v3434_v28 = vpop.f32.mrb[13].mxu0 }
 0x260   : > { %2388 = vmatprep.mubr.f32.mxu0 %v830_v26 }
 0x261   : > { %v835_v29 = vpop.f32.mrb[46].mxu1  ;;  %v3436_v30 = vpop.f32.mrb[14].mxu0 }
 0x262   : > { %v836_v31 = vadd.f32 %v835_v29, %v3385_v61  ;;  %v3439_v32 = vpop.f32.mrb[47].mxu1  ;;  %v3441_v33 = vpop.f32.mrb[15].mxu0 }
 0x264   : > { %2389 = vmatmul.mubr.f32.gmra.mrb[38].mxu0 %v836_v31 }
 0x265   : > { %v841_v34 = vpop.f32.mrb[48].mxu1  ;;  %v3443_v36 = vpop.f32.mrb[16].mxu0 }
 0x266   : > { %v842_v37 = vadd.f32 %v841_v34, %v3385_v61  ;;  %v3446_v38 = vpop.f32.mrb[49].mxu1  ;;  %v3448_v41 = vpop.f32.mrb[17].mxu0  ;;  %v3494_v34 = vrot.slane %v3381_v0, %v3253_v42 }
 0x268   : > { %2391 = vmatprep.mubr.f32.mxu0 %v842_v37  ;;  %v720_v37 = vsub.s32 4, %v3244_v39 }
 0x269   : > { %v847_v45 = vpop.f32.mrb[50].mxu1  ;;  %v3450_v46 = vpop.f32.mrb[18].mxu0 }
 0x26a   : > { %v848_v47 = vadd.f32 %v847_v45, %v3385_v61  ;;  %v3453_v48 = vpop.f32.mrb[51].mxu1  ;;  %v3455_v50 = vpop.f32.mrb[19].mxu0 }
 0x26c   : > { %2392 = vmatmul.mubr.f32.gmra.mrb[40].mxu0 %v848_v47 }
 0x26d   : > { %v853_v51 = vpop.f32.mrb[52].mxu1  ;;  %v3457_v52 = vpop.f32.mrb[20].mxu0 }
 0x26e   : > { %v854_v53 = vadd.f32 %v853_v51, %v3385_v61  ;;  %v3460_v43 = vpop.f32.mrb[53].mxu1  ;;  %v3462_v44 = vpop.f32.mrb[21].mxu0 }
 0x270   : > { %2394 = vmatprep.mubr.f32.mxu0 %v854_v53 }
 0x271   : > { %v859_v54 = vpop.f32.mrb[54].mxu1  ;;  %v3464_v55 = vpop.f32.mrb[22].mxu0 }
 0x272   : > { %v860_v56 = vadd.f32 %v859_v54, %v3385_v61  ;;  %v3467_v57 = vpop.f32.mrb[55].mxu1  ;;  %v3469_v6 = vpop.f32.mrb[23].mxu0 }
 0x274   : > { %2395 = vmatmul.mubr.f32.gmra.mrb[42].mxu0 %v860_v56  ;;  %v796_v56 = vadd.f32 %v3390_v35, %v3494_v34  ;;  %v814_v35 = vadd.f32 %v3411_v10, %v3494_v34 }
 0x275   : > { %v865_v25 = vpop.f32.mrb[56].mxu1  ;;  %v3471_v58 = vpop.f32.mrb[24].mxu0 }
 0x276   : > { %v866_v60 = vadd.f32 %v865_v25, %v3385_v61  ;;  %v3474_v1 = vpop.f32.mrb[57].mxu1  ;;  %v3476_v3 = vpop.f32.mrb[25].mxu0  ;;  %v3507_v25 = vrot.slane %v3381_v0, %v720_v37 }
 0x278   : > { %2397 = vmatprep.mubr.f32.mxu0 %v866_v60 }
 0x279   : > { %v871_v7 = vpop.f32.mrb[58].mxu1  ;;  %v3478_v9 = vpop.f32.mrb[26].mxu0 }
 0x27a   : > { %v872_v12 = vadd.f32 %v871_v7, %v3385_v61  ;;  %v3481_v14 = vpop.f32.mrb[59].mxu1  ;;  %v3483_v18 = vpop.f32.mrb[27].mxu0  ;;  %v802_v7 = vadd.f32 %v3397_v62, %v3494_v34 }
 0x27c   : > { %2398 = vmatmul.mubr.f32.gmra.mrb[44].mxu0 %v872_v12 }
 0x27d   : > { %v877_v20 = vpop.f32.mrb[60].mxu1  ;;  %v3485_v23 = vpop.f32.mrb[28].mxu0 }
 0x27e   : > { %v878_v26 = vadd.f32 %v877_v20, %v3385_v61  ;;  %v3488_v29 = vpop.f32.mrb[61].mxu1  ;;  %v3490_v31 = vpop.f32.mrb[29].mxu0 }
 0x280   : > { %2400 = vmatprep.mubr.f32.mxu0 %v878_v26 }
 0x281   : > { %v883_v45 = vpop.f32.mrb[62].mxu1  ;;  %v3497_v47 = vpop.f32.mrb[30].mxu0 }
 0x282   : > { %v884_v51 = vadd.f32 %v883_v45, %v3385_v61  ;;  %v3500_v53 = vpop.f32.mrb[63].mxu1  ;;  %v3502_v54 = vpop.f32.mrb[31].mxu0  ;;  %v808_v61 = vadd.f32 %v3404_v4, %v3494_v34  ;;  %v820_v45 = vadd.f32 %v3418_v15, %v3494_v34  ;;  %v826_v4 = vadd.f32 %v3425_v21, %v3494_v34 }
 0x283   : > { %v838_v15 = vadd.f32 %v3439_v32, %v3494_v34 }
 0x284   : > { %2401 = vmatmul.mubr.f32.gmra.mrb[46].mxu0 %v884_v51 }
 0x285   : > { %v2325_v60 = vpop.f32.mrb[64].mxu1  ;;  %2403 = vmatprep.mubr.f32.mxu0 %v796_v56 }
 0x286   : > { %v1115_v12 = vpop.f32.mrb[65].mxu1  ;;  %v1121_v51 = vadd.f32 %v2325_v60, %v3507_v25 }
 0x287   : > { %v1116_v20 = vadd.f32 %v1115_v12, %v3507_v25 }
 0x288   : > { %2404 = vmatmul.mubr.f32.gmra.mrb[48].mxu0 %v802_v7  ;;  %v832_v7 = vadd.f32 %v3432_v27, %v3494_v34  ;;  %v850_v27 = vadd.f32 %v3453_v48, %v3494_v34 }
 0x289   : > { %v2328_v26 = vpop.f32.mrb[66].mxu1  ;;  %1194 = vxpose.xlu0.b32.start [1/16] (narrow) %v1116_v20, 8  ;;  %2406 = vmatprep.mubr.f32.mxu0 %v808_v61  ;;  %v844_v61 = vadd.f32 %v3446_v38, %v3494_v34  ;;  %v862_v38 = vadd.f32 %v3467_v57, %v3494_v34 }
 0x28a   : > { %v1125_v37 = vpop.f32.mrb[67].mxu1  ;;  %v1131_v20 = vadd.f32 %v2328_v26, %v3507_v25 }
 0x28b   : > { %v1126_v12 = vadd.f32 %v1125_v37, %v3507_v25  ;;  %v856_v37 = vadd.f32 %v3460_v43, %v3494_v34  ;;  %v874_v43 = vadd.f32 %v3481_v14, %v3494_v34 }
 0x28c   : > { %2407 = vmatmul.mubr.f32.gmra.mrb[50].mxu0 %v814_v35 }
 0x28d   : > { %v2331_v62 = vpop.f32.mrb[68].mxu1  ;;  %1195 = vxpose.xlu0.b32.cont [2/16] (narrow) %v1121_v51, 8  ;;  %2409 = vmatprep.mubr.f32.mxu0 %v820_v45  ;;  %v712_v51 = vsub.s32 2, %v3244_v39 }
 0x28e   : > { %v1135_v56 = vpop.f32.mrb[69].mxu1  ;;  %v1141_v48 = vadd.f32 %v2331_v62, %v3507_v25  ;;  %v886_v62 = vadd.f32 %v3500_v53, %v3494_v34 }
 0x28f   : > { %v1136_v45 = vadd.f32 %v1135_v56, %v3507_v25  ;;  %v713_v57 = vrot.slane %v3381_v0, %v712_v51 }
 0x290   : > { %2410 = vmatmul.mubr.f32.gmra.mrb[52].mxu0 %v826_v4  ;;  %v868_v4 = vadd.f32 %v3474_v1, %v3494_v34 }
 0x291   : > { %v2334_v10 = vpop.f32.mrb[70].mxu1  ;;  %1196 = vxpose.xlu0.b32.cont [3/16] (narrow) %v1126_v12, 8  ;;  %2412 = vmatprep.mubr.f32.mxu0 %v832_v7  ;;  %v880_v12 = vadd.f32 %v3488_v29, %v3494_v34  ;;  %v955_v14 = vadd.f32 %v3387_v16, %v713_v57  ;;  %v967_v29 = vadd.f32 %v3401_v2, %v713_v57 }
 0x292   : > { %v1145_v60 = vpop.f32.mrb[71].mxu1  ;;  %v979_v34 = vadd.f32 %v3415_v13, %v713_v57  ;;  %v985_v53 = vadd.f32 %v3422_v19, %v713_v57  ;;  %v1015_v19 = vadd.f32 %v3457_v52, %v713_v57 }
 0x294   : > { %2413 = vmatmul.mubr.f32.gmra.mrb[54].mxu0 %v838_v15  ;;  %v1146_v15 = vadd.f32 %v1145_v60, %v3507_v25 }
 0x295   : > { %v2337_v21 = vpop.f32.mrb[72].mxu1  ;;  %1197 = vxpose.xlu0.b32.cont [4/16] (narrow) %v1131_v20, 8  ;;  %2415 = vmatprep.mubr.f32.mxu0 %v844_v61  ;;  %v1151_v20 = vadd.f32 %v2334_v10, %v3507_v25  ;;  %v997_v10 = vadd.f32 %v3436_v30, %v713_v57  ;;  %v716_v30 = vsub.s32 3, %v3244_v39 }
 0x296   : > { %v1155_v35 = vpop.f32.mrb[73].mxu1  ;;  %v1161_v16 = vadd.f32 %v2337_v21, %v3507_v25  ;;  %v1009_v21 = vadd.f32 %v3450_v46, %v713_v57  ;;  %v1033_v46 = vadd.f32 %v3478_v9, %v713_v57 }
 0x297   : > { %v1156_v60 = vadd.f32 %v1155_v35, %v3507_v25  ;;  %v1021_v35 = vadd.f32 %v3464_v55, %v713_v57  ;;  %v717_v52 = vrot.slane %v3381_v0, %v716_v30  ;;  %v1045_v55 = vadd.f32 %v3497_v47, %v713_v57 }
 0x298   : > { %2416 = vmatmul.mubr.f32.gmra.mrb[56].mxu0 %v850_v27  ;;  %v961_v27 = vadd.f32 %v3394_v59, %v713_v57  ;;  %v991_v59 = vadd.f32 %v3429_v24, %v713_v57 }
 0x299   : > { %v2340_v32 = vpop.f32.mrb[74].mxu1  ;;  %1198 = vxpose.xlu0.b32.cont [5/16] (narrow) %v1136_v45, 8  ;;  %2418 = vmatprep.mubr.f32.mxu0 %v856_v37  ;;  %v973_v37 = vadd.f32 %v3408_v8, %v713_v57  ;;  %v1003_v8 = vadd.f32 %v3443_v36, %v713_v57  ;;  %v1027_v36 = vadd.f32 %v3471_v58, %v713_v57 }
 0x29a   : > { %v1165_v26 = vpop.f32.mrb[75].mxu1  ;;  %v1171_v13 = vadd.f32 %v2340_v32, %v3507_v25  ;;  %v1039_v32 = vadd.f32 %v3485_v23, %v713_v57  ;;  %v957_v58 = vadd.f32 %v3392_v49, %v717_v52  ;;  %v963_v9 = vadd.f32 %v3399_v63, %v717_v52 }
 0x29b   : > { %v1166_v2 = vadd.f32 %v1165_v26, %v3507_v25  ;;  %v969_v0 = vadd.f32 %v3406_v5, %v717_v52  ;;  %v975_v23 = vadd.f32 %v3413_v11, %v717_v52  ;;  %v987_v47 = vadd.f32 %v3427_v22, %v717_v52 }
 0x29c   : > { %2419 = vmatmul.mubr.f32.gmra.mrb[58].mxu0 %v862_v38  ;;  %v993_v49 = vadd.f32 %v3434_v28, %v717_v52  ;;  %v1005_v63 = vadd.f32 %v3448_v41, %v717_v52  ;;  %v1011_v5 = vadd.f32 %v3455_v50, %v717_v52  ;;  %v1017_v11 = vadd.f32 %v3462_v44, %v717_v52 }
 0x29d   : > { %v2343_v7 = vpop.f32.mrb[76].mxu1  ;;  %1199 = vxpose.xlu0.b32.cont [6/16] (narrow) %v1141_v48, 8  ;;  %2421 = vmatprep.mubr.f32.mxu0 %v868_v4  ;;  %v981_v4 = vadd.f32 %v3420_v17, %v717_v52  ;;  %v1023_v17 = vadd.f32 %v3469_v6, %v717_v52  ;;  %v1029_v22 = vadd.f32 %v3476_v3, %v717_v52 }
 0x29e   : > { %v1175_v56 = vpop.f32.mrb[77].mxu1  ;;  %v1181_v45 = vadd.f32 %v2343_v7, %v3507_v25  ;;  %v1035_v28 = vadd.f32 %v3483_v18, %v717_v52  ;;  %v1047_v41 = vadd.f32 %v3502_v54, %v717_v52 }
 0x29f   : > { %v1176_v24 = vadd.f32 %v1175_v56, %v3507_v25 }
 0x2a0   : > { %2422 = vmatmul.mubr.f32.gmra.mrb[60].mxu0 %v874_v43 }
 0x2a1   : > { %v2346_v1 = vpop.f32.mrb[78].mxu1  ;;  %1200 = vxpose.xlu0.b32.cont [7/16] (narrow) %v1146_v15, 8  ;;  %2424 = vmatprep.mubr.f32.mxu0 %v880_v12 }
 0x2a2   : > { %v1185_v61 = vpop.f32.mrb[79].mxu1  ;;  %v1191_v26 = vadd.f32 %v2346_v1, %v3507_v25 }
 0x2a3   : > { %v1186_v38 = vadd.f32 %v1185_v61, %v3507_v25  ;;  %v999_v25 = vadd.f32 %v3441_v33, %v717_v52  ;;  %v1041_v33 = vadd.f32 %v3490_v31, %v717_v52 }
 0x2a4   : > { %2425 = vmatmul.mubr.f32.gmra.mrb[62].mxu0 %v886_v62 }
 0x2a5   : > { %1201 = vxpose.xlu0.b32.cont [8/16] (narrow) %v1151_v20, 8  ;;  %2427 = vmatprep.mubr.f32.mxu0 %v955_v14 }
 0x2a8   : > { %2428 = vmatmul.mubr.f32.gmra.mrb[64].mxu0 %v961_v27 }
 0x2a9   : > { %1202 = vxpose.xlu0.b32.cont [9/16] (narrow) %v1156_v60, 8  ;;  %2430 = vmatprep.mubr.f32.mxu0 %v967_v29 }
 0x2ac   : > { %2431 = vmatmul.mubr.f32.gmra.mrb[66].mxu0 %v973_v37 }
 0x2ad   : > { %1203 = vxpose.xlu0.b32.cont [10/16] (narrow) %v1161_v16, 8  ;;  %2433 = vmatprep.mubr.f32.mxu0 %v979_v34 }
 0x2b0   : > { %2434 = vmatmul.mubr.f32.gmra.mrb[68].mxu0 %v985_v53 }
 0x2b1   : > { %1204 = vxpose.xlu0.b32.cont [11/16] (narrow) %v1166_v2, 8  ;;  %2436 = vmatprep.mubr.f32.mxu0 %v991_v59 }
 0x2b4   : > { %2437 = vmatmul.mubr.f32.gmra.mrb[70].mxu0 %v997_v10 }
 0x2b5   : > { %1205 = vxpose.xlu0.b32.cont [12/16] (narrow) %v1171_v13, 8  ;;  %2439 = vmatprep.mubr.f32.mxu0 %v1003_v8 }
 0x2b8   : > { %2440 = vmatmul.mubr.f32.gmra.mrb[72].mxu0 %v1009_v21 }
 0x2b9   : > { %1206 = vxpose.xlu0.b32.cont [13/16] (narrow) %v1176_v24, 8  ;;  %2442 = vmatprep.mubr.f32.mxu0 %v1015_v19 }
 0x2bc   : > { %2443 = vmatmul.mubr.f32.gmra.mrb[74].mxu0 %v1021_v35 }
 0x2bd   : > { %1207 = vxpose.xlu0.b32.cont [14/16] (narrow) %v1181_v45, 8  ;;  %2445 = vmatprep.mubr.f32.mxu0 %v1027_v36 }
 0x2c0   : > { %2446 = vmatmul.mubr.f32.gmra.mrb[76].mxu0 %v1033_v46 }
 0x2c1   : > { %1208 = vxpose.xlu0.b32.cont [15/16] (narrow) %v1186_v38, 8  ;;  %2448 = vmatprep.mubr.f32.mxu0 %v1039_v32 }
 0x2c4   : > { %2449 = vmatmul.mubr.f32.gmra.mrb[78].mxu0 %v1045_v55 }
 0x2c5   : > { %1209 = vxpose.xlu0.b32.end [16/16] (narrow) %v1191_v26, 8  ;;  %2451 = vmatprep.mubr.f32.mxu0 %v957_v58 }
 0x2c8   : > { %2452 = vmatmul.mubr.f32.gmra.mrb[80].mxu0 %v963_v9 }
 0x2c9   : > { %2454 = vmatprep.mubr.f32.mxu0 %v969_v0 }
 0x2cc   : > { %2455 = vmatmul.mubr.f32.gmra.mrb[82].mxu0 %v975_v23 }
 0x2cd   : > { %2457 = vmatprep.mubr.f32.mxu0 %v981_v4 }
 0x2d0   : > { %2458 = vmatmul.mubr.f32.gmra.mrb[84].mxu0 %v987_v47 }
 0x2d1   : > { %2460 = vmatprep.mubr.f32.mxu0 %v993_v49 }
 0x2d4   : > { %2461 = vmatmul.mubr.f32.gmra.mrb[86].mxu0 %v999_v25 }
 0x2d5   : > { %2463 = vmatprep.mubr.f32.mxu0 %v1005_v63 }
 0x2d8   : > { %2464 = vmatmul.mubr.f32.gmra.mrb[88].mxu0 %v1011_v5 }
 0x2d9   : > { %2466 = vmatprep.mubr.f32.mxu0 %v1017_v11 }
 0x2dc   : > { %2467 = vmatmul.mubr.f32.gmra.mrb[90].mxu0 %v1023_v17 }
 0x2dd   : > { %2469 = vmatprep.mubr.f32.mxu0 %v1029_v22 }
 0x2e0   : > { %2470 = vmatmul.mubr.f32.gmra.mrb[92].mxu0 %v1035_v28 }
 0x2e1   : > { %2472 = vmatprep.mubr.f32.mxu0 %v1041_v33 }
 0x2e4   : > { %2473 = vmatmul.mubr.f32.gmra.mrb[94].mxu0 %v1047_v41 }
 0x309   : > { %v1210_v50 = vpop.trf.xlu0 }
 0x30a   : > { %v1630_v44 = vrot.slane %v1210_v50, %v3247_v40  ;;  %v3597_v48 = vrot.slane %v1210_v50, %v3253_v42  ;;  %v3604_v6 = vrot.slane %v1210_v50, %v712_v51  ;;  %v3628_v51 = vrot.slane %v1210_v50, %v716_v30 }
 0x30c   : > { %1699 = vbcast.lane.b32.xlu0 %v3597_v48, 256  ;;  %1632 = vbcast.lane.b32.xlu1 %v1630_v44, 256 }
 0x310   : > { %1747 = vbcast.lane.b32.xlu0 %v3597_v48, 352  ;;  %1636 = vbcast.lane.b32.xlu1 %v1630_v44, 264 }
 0x314   : > { %1755 = vbcast.lane.b32.xlu0 %v3597_v48, 368  ;;  %1640 = vbcast.lane.b32.xlu1 %v1630_v44, 272 }
 0x318   : > { %1766 = vbcast.lane.b32.xlu0 %v3604_v6, 256  ;;  %1644 = vbcast.lane.b32.xlu1 %v1630_v44, 280 }
 0x31c   : > { %1774 = vbcast.lane.b32.xlu0 %v3604_v6, 272  ;;  %1648 = vbcast.lane.b32.xlu1 %v1630_v44, 288 }
 0x31f   : > { %v3608_v40 = vpop.f32.mrb[32].mxu0 }
 0x320   : > { %1782 = vbcast.lane.b32.xlu0 %v3604_v6, 288  ;;  %1652 = vbcast.lane.b32.xlu1 %v1630_v44, 296  ;;  %v3611_v42 = vpop.f32.mrb[33].mxu0 }
 0x324   : > { %1790 = vbcast.lane.b32.xlu0 %v3604_v6, 304  ;;  %1656 = vbcast.lane.b32.xlu1 %v1630_v44, 304 }
 0x327   : > { %v3614_v3 = vpop.f32.mrb[34].mxu0 }
 0x328   : > { %1798 = vbcast.lane.b32.xlu0 %v3604_v6, 320  ;;  %1660 = vbcast.lane.b32.xlu1 %v1630_v44, 312  ;;  %v3617_v18 = vpop.f32.mrb[35].mxu0 }
 0x32c   : > { %1806 = vbcast.lane.b32.xlu0 %v3604_v6, 336  ;;  %1664 = vbcast.lane.b32.xlu1 %v1630_v44, 320 }
 0x32f   : > { %v3620_v31 = vpop.f32.mrb[36].mxu0 }
 0x330   : > { %1814 = vbcast.lane.b32.xlu0 %v3604_v6, 352  ;;  %1668 = vbcast.lane.b32.xlu1 %v1630_v44, 328  ;;  %v3623_v54 = vpop.f32.mrb[37].mxu0 }
 0x334   : > { %1822 = vbcast.lane.b32.xlu0 %v3604_v6, 368  ;;  %1672 = vbcast.lane.b32.xlu1 %v1630_v44, 336 }
 0x337   : > { %v3630_v7 = vpop.f32.mrb[38].mxu0 }
 0x338   : > { %1833 = vbcast.lane.b32.xlu0 %v3628_v51, 256  ;;  %1676 = vbcast.lane.b32.xlu1 %v1630_v44, 344  ;;  %v3633_v43 = vpop.f32.mrb[39].mxu0 }
 0x33c   : > { %1841 = vbcast.lane.b32.xlu0 %v3628_v51, 272  ;;  %1680 = vbcast.lane.b32.xlu1 %v1630_v44, 352 }
 0x33f   : > { %v3636_v56 = vpop.f32.mrb[40].mxu0 }
 0x340   : > { %1849 = vbcast.lane.b32.xlu0 %v3628_v51, 288  ;;  %1684 = vbcast.lane.b32.xlu1 %v1630_v44, 360  ;;  %v3639_v57 = vpop.f32.mrb[41].mxu0 }
 0x344   : > { %1857 = vbcast.lane.b32.xlu0 %v3628_v51, 304  ;;  %1688 = vbcast.lane.b32.xlu1 %v1630_v44, 368 }
 0x347   : > { %v3642_v39 = vpop.f32.mrb[42].mxu0 }
 0x348   : > { %1865 = vbcast.lane.b32.xlu0 %v3628_v51, 320  ;;  %1692 = vbcast.lane.b32.xlu1 %v1630_v44, 376  ;;  %v3645_v12 = vpop.f32.mrb[43].mxu0 }
 0x34c   : > { %1873 = vbcast.lane.b32.xlu0 %v3628_v51, 336  ;;  %1703 = vbcast.lane.b32.xlu1 %v3597_v48, 264 }
 0x34f   : > { %v3649_v15 = vpop.f32.mrb[44].mxu0 }
 0x350   : > { %1881 = vbcast.lane.b32.xlu0 %v3628_v51, 352  ;;  %1707 = vbcast.lane.b32.xlu1 %v3597_v48, 272  ;;  %v3653_v1 = vpop.f32.mrb[45].mxu0 }
 0x354   : > { %1889 = vbcast.lane.b32.xlu0 %v3628_v51, 368  ;;  %1711 = vbcast.lane.b32.xlu1 %v3597_v48, 280 }
 0x357   : > { %v3657_v62 = vpop.f32.mrb[46].mxu0 }
 0x358   : > { %1715 = vbcast.lane.b32.xlu1 %v3597_v48, 288  ;;  %v3660_v61 = vpop.f32.mrb[47].mxu0 }
 0x35b   : > { %v3662_v14 = vpop.f32.mrb[48].mxu0 }
 0x35c   : > { %1719 = vbcast.lane.b32.xlu1 %v3597_v48, 296  ;;  %v1388_v20 = vpop.f32.mrb[49].mxu0 }
 0x35f   : > { %v3665_v27 = vpop.f32.mrb[50].mxu0 }
 0x360   : > { %1723 = vbcast.lane.b32.xlu1 %v3597_v48, 304  ;;  %v3668_v29 = vpop.f32.mrb[51].mxu0 }
 0x363   : > { %v3670_v60 = vpop.f32.mrb[52].mxu0 }
 0x364   : > { %1727 = vbcast.lane.b32.xlu1 %v3597_v48, 312  ;;  %v3673_v37 = vpop.f32.mrb[53].mxu0 }
 0x367   : > { %v3675_v34 = vpop.f32.mrb[54].mxu0 }
 0x368   : > { %1731 = vbcast.lane.b32.xlu1 %v3597_v48, 320  ;;  %v3678_v16 = vpop.f32.mrb[55].mxu0 }
 0x36b   : > { %v3680_v53 = vpop.f32.mrb[56].mxu0 }
 0x36c   : > { %1735 = vbcast.lane.b32.xlu1 %v3597_v48, 328  ;;  %v3683_v59 = vpop.f32.mrb[57].mxu0 }
 0x36f   : > { %v3685_v2 = vpop.f32.mrb[58].mxu0 }
 0x370   : > { %1739 = vbcast.lane.b32.xlu1 %v3597_v48, 336  ;;  %v3688_v10 = vpop.f32.mrb[59].mxu0 }
 0x373   : > { %v3690_v8 = vpop.f32.mrb[60].mxu0 }
 0x374   : > { %1743 = vbcast.lane.b32.xlu1 %v3597_v48, 344  ;;  %v1448_v13 = vpop.f32.mrb[61].mxu0 }
 0x377   : > { %v3693_v21 = vpop.f32.mrb[62].mxu0 }
 0x378   : > { %1751 = vbcast.lane.b32.xlu1 %v3597_v48, 360  ;;  %v1458_v19 = vpop.f32.mrb[63].mxu0 }
 0x37b   : > { %v3696_v24 = vpop.f32.mrb[64].mxu0 }
 0x37c   : > { %1759 = vbcast.lane.b32.xlu1 %v3597_v48, 376  ;;  %v1468_v35 = vpop.f32.mrb[65].mxu0 }
 0x37e   : > { %v1700_v30 = vpop.permute.xlu0 %1699  ;;  %v1633_v36 = vpop.permute.xlu1 %1632 }
 0x37f   : > { %v1911_v45 = vadd.f32 %v1700_v30, %v1388_v20  ;;  %v1895_v46 = vadd.f32 %v1633_v36, %v3611_v42  ;;  %v3701_v52 = vpop.f32.mrb[66].mxu0 }
 0x380   : > { %1770 = vbcast.lane.b32.xlu1 %v3604_v6, 264  ;;  %v1478_v32 = vpop.f32.mrb[67].mxu0 }
 0x381   : > { %1975 = vst [vmem:[%s3704_s9 + $0x80] sm:$0xff] %v1911_v45  ;;  %1959 = vst [vmem:[%s3704_s9] sm:$0xff] %v1895_v46 }
 0x382   : > { %v1748_v38 = vpop.permute.xlu0 %1747  ;;  %v1637_v55 = vpop.permute.xlu1 %1636 }
 0x383   : > { %v1923_v58 = vadd.f32 %v1748_v38, %v1448_v13  ;;  %v1896_v26 = vadd.f32 %v3608_v40, %v1637_v55  ;;  %v3709_v9 = vpop.f32.mrb[68].mxu0 }
 0x384   : > { %1778 = vbcast.lane.b32.xlu1 %v3604_v6, 280  ;;  %v1488_v0 = vpop.f32.mrb[69].mxu0 }
 0x385   : > { %1987 = vst [vmem:[%s3704_s9 + $0xe0] sm:$0xff] %v1923_v58  ;;  %1960 = vst [vmem:[%s3704_s9 + $0x8] sm:$0xff] %v1896_v26 }
 0x386   : > { %v1756_v23 = vpop.permute.xlu0 %1755  ;;  %v1641_v4 = vpop.permute.xlu1 %1640 }
 0x387   : > { %v1925_v47 = vadd.f32 %v1756_v23, %v1458_v19  ;;  %v1897_v49 = vadd.f32 %v1641_v4, %v3617_v18  ;;  %v3715_v25 = vpop.f32.mrb[70].mxu0 }
 0x388   : > { %1786 = vbcast.lane.b32.xlu1 %v3604_v6, 296  ;;  %v1498_v63 = vpop.f32.mrb[71].mxu0 }
 0x389   : > { %1989 = vst [vmem:[%s3704_s9 + $0xf0] sm:$0xff] %v1925_v47  ;;  %1961 = vst [vmem:[%s3704_s9 + $0x10] sm:$0xff] %v1897_v49 }
 0x38a   : > { %v1767_v5 = vpop.permute.xlu0 %1766  ;;  %v1645_v11 = vpop.permute.xlu1 %1644 }
 0x38b   : > { %v1927_v17 = vadd.f32 %v1767_v5, %v1468_v35  ;;  %v1898_v22 = vadd.f32 %v3614_v3, %v1645_v11  ;;  %v3721_v28 = vpop.f32.mrb[72].mxu0 }
 0x38c   : > { %1794 = vbcast.lane.b32.xlu1 %v3604_v6, 312  ;;  %v1508_v33 = vpop.f32.mrb[73].mxu0 }
 0x38d   : > { %1991 = vst [vmem:[%s3704_s9 + $0x100] sm:$0xff] %v1927_v17  ;;  %1962 = vst [vmem:[%s3704_s9 + $0x18] sm:$0xff] %v1898_v22 }
 0x38e   : > { %v1775_v41 = vpop.permute.xlu0 %1774  ;;  %v1649_v50 = vpop.permute.xlu1 %1648 }
 0x38f   : > { %v1929_v44 = vadd.f32 %v1775_v41, %v1478_v32  ;;  %v1899_v48 = vadd.f32 %v1649_v50, %v3623_v54  ;;  %v3727_v40 = vpop.f32.mrb[74].mxu0 }
 0x390   : > { %1802 = vbcast.lane.b32.xlu1 %v3604_v6, 328  ;;  %v1518_v42 = vpop.f32.mrb[75].mxu0 }
 0x391   : > { %1993 = vst [vmem:[%s3704_s9 + $0x110] sm:$0xff] %v1929_v44  ;;  %1963 = vst [vmem:[%s3704_s9 + $0x20] sm:$0xff] %v1899_v48 }
 0x392   : > { %v1783_v3 = vpop.permute.xlu0 %1782  ;;  %v1653_v18 = vpop.permute.xlu1 %1652 }
 0x393   : > { %v1931_v20 = vadd.f32 %v1783_v3, %v1488_v0  ;;  %v1900_v13 = vadd.f32 %v3620_v31, %v1653_v18  ;;  %v3733_v19 = vpop.f32.mrb[76].mxu0 }
 0x394   : > { %1810 = vbcast.lane.b32.xlu1 %v3604_v6, 344  ;;  %v1528_v35 = vpop.f32.mrb[77].mxu0 }
 0x395   : > { %1995 = vst [vmem:[%s3704_s9 + $0x120] sm:$0xff] %v1931_v20  ;;  %1964 = vst [vmem:[%s3704_s9 + $0x28] sm:$0xff] %v1900_v13 }
 0x396   : > { %v1791_v54 = vpop.permute.xlu0 %1790  ;;  %v1657_v30 = vpop.permute.xlu1 %1656 }
 0x397   : > { %v1933_v36 = vadd.f32 %v1791_v54, %v1498_v63  ;;  %v1901_v45 = vadd.f32 %v1657_v30, %v3633_v43  ;;  %v3739_v46 = vpop.f32.mrb[78].mxu0 }
 0x398   : > { %1818 = vbcast.lane.b32.xlu1 %v3604_v6, 360  ;;  %v1538_v32 = vpop.f32.mrb[79].mxu0 }
 0x399   : > { %1997 = vst [vmem:[%s3704_s9 + $0x130] sm:$0xff] %v1933_v36  ;;  %1965 = vst [vmem:[%s3704_s9 + $0x30] sm:$0xff] %v1901_v45 }
 0x39a   : > { %v1799_v31 = vpop.permute.xlu0 %1798  ;;  %v1661_v38 = vpop.permute.xlu1 %1660 }
 0x39b   : > { %v1935_v55 = vadd.f32 %v1799_v31, %v1508_v33  ;;  %v1902_v58 = vadd.f32 %v3630_v7, %v1661_v38  ;;  %v3745_v26 = vpop.f32.mrb[80].mxu0 }
 0x39c   : > { %1826 = vbcast.lane.b32.xlu1 %v3604_v6, 376  ;;  %v1548_v0 = vpop.f32.mrb[81].mxu0 }
 0x39d   : > { %1999 = vst [vmem:[%s3704_s9 + $0x140] sm:$0xff] %v1935_v55  ;;  %1966 = vst [vmem:[%s3704_s9 + $0x38] sm:$0xff] %v1902_v58 }
 0x39e   : > { %v1807_v43 = vpop.permute.xlu0 %1806  ;;  %v1665_v23 = vpop.permute.xlu1 %1664 }
 0x39f   : > { %v1937_v4 = vadd.f32 %v1807_v43, %v1518_v42  ;;  %v1903_v47 = vadd.f32 %v1665_v23, %v3639_v57  ;;  %v3751_v49 = vpop.f32.mrb[82].mxu0 }
 0x3a0   : > { %1837 = vbcast.lane.b32.xlu1 %v3628_v51, 264  ;;  %v1558_v63 = vpop.f32.mrb[83].mxu0 }
 0x3a1   : > { %2001 = vst [vmem:[%s3704_s9 + $0x150] sm:$0xff] %v1937_v4  ;;  %1967 = vst [vmem:[%s3704_s9 + $0x40] sm:$0xff] %v1903_v47 }
 0x3a2   : > { %v1815_v7 = vpop.permute.xlu0 %1814  ;;  %v1669_v6 = vpop.permute.xlu1 %1668 }
 0x3a3   : > { %v1939_v5 = vadd.f32 %v1815_v7, %v1528_v35  ;;  %v1904_v11 = vadd.f32 %v3636_v56, %v1669_v6  ;;  %v3757_v17 = vpop.f32.mrb[84].mxu0 }
 0x3a4   : > { %1845 = vbcast.lane.b32.xlu1 %v3628_v51, 280  ;;  %v1568_v22 = vpop.f32.mrb[85].mxu0 }
 0x3a5   : > { %2003 = vst [vmem:[%s3704_s9 + $0x160] sm:$0xff] %v1939_v5  ;;  %1968 = vst [vmem:[%s3704_s9 + $0x48] sm:$0xff] %v1904_v11 }
 0x3a6   : > { %v1823_v57 = vpop.permute.xlu0 %1822  ;;  %v1673_v33 = vpop.permute.xlu1 %1672 }
 0x3a7   : > { %v1941_v41 = vadd.f32 %v1823_v57, %v1538_v32  ;;  %v1905_v50 = vadd.f32 %v1673_v33, %v3645_v12  ;;  %v3763_v44 = vpop.f32.mrb[86].mxu0 }
 0x3a8   : > { %1853 = vbcast.lane.b32.xlu1 %v3628_v51, 296  ;;  %v1578_v48 = vpop.f32.mrb[87].mxu0 }
 0x3a9   : > { %2005 = vst [vmem:[%s3704_s9 + $0x170] sm:$0xff] %v1941_v41  ;;  %1969 = vst [vmem:[%s3704_s9 + $0x50] sm:$0xff] %v1905_v50 }
 0x3aa   : > { %v1834_v56 = vpop.permute.xlu0 %1833  ;;  %v1677_v42 = vpop.permute.xlu1 %1676 }
 0x3ab   : > { %v1943_v3 = vadd.f32 %v1834_v56, %v1548_v0  ;;  %v1906_v18 = vadd.f32 %v3642_v39, %v1677_v42  ;;  %v3769_v20 = vpop.f32.mrb[88].mxu0 }
 0x3ac   : > { %1861 = vbcast.lane.b32.xlu1 %v3628_v51, 312  ;;  %v1588_v13 = vpop.f32.mrb[89].mxu0 }
 0x3ad   : > { %2007 = vst [vmem:[%s3704_s9 + $0x180] sm:$0xff] %v1943_v3  ;;  %1970 = vst [vmem:[%s3704_s9 + $0x58] sm:$0xff] %v1906_v18 }
 0x3ae   : > { %v1842_v12 = vpop.permute.xlu0 %1841  ;;  %v1681_v35 = vpop.permute.xlu1 %1680 }
 0x3af   : > { %v1945_v54 = vadd.f32 %v1842_v12, %v1558_v63  ;;  %v1907_v30 = vadd.f32 %v1681_v35, %v3653_v1  ;;  %v3775_v36 = vpop.f32.mrb[90].mxu0 }
 0x3b0   : > { %1869 = vbcast.lane.b32.xlu1 %v3628_v51, 328  ;;  %v1598_v45 = vpop.f32.mrb[91].mxu0 }
 0x3b1   : > { %2009 = vst [vmem:[%s3704_s9 + $0x190] sm:$0xff] %v1945_v54  ;;  %1971 = vst [vmem:[%s3704_s9 + $0x60] sm:$0xff] %v1907_v30 }
 0x3b2   : > { %v1850_v39 = vpop.permute.xlu0 %1849  ;;  %v1685_v32 = vpop.permute.xlu1 %1684 }
 0x3b3   : > { %v1947_v31 = vadd.f32 %v1850_v39, %v1568_v22  ;;  %v1908_v38 = vadd.f32 %v3649_v15, %v1685_v32  ;;  %v3781_v55 = vpop.f32.mrb[92].mxu0 }
 0x3b4   : > { %1877 = vbcast.lane.b32.xlu1 %v3628_v51, 344  ;;  %v1608_v58 = vpop.f32.mrb[93].mxu0 }
 0x3b5   : > { %2011 = vst [vmem:[%s3704_s9 + $0x1a0] sm:$0xff] %v1947_v31  ;;  %1972 = vst [vmem:[%s3704_s9 + $0x68] sm:$0xff] %v1908_v38 }
 0x3b6   : > { %v1858_v1 = vpop.permute.xlu0 %1857  ;;  %v1689_v0 = vpop.permute.xlu1 %1688 }
 0x3b7   : > { %v1949_v43 = vadd.f32 %v1858_v1, %v1578_v48  ;;  %v1909_v23 = vadd.f32 %v1689_v0, %v3660_v61  ;;  %v3787_v4 = vpop.f32.mrb[94].mxu0 }
 0x3b8   : > { %1885 = vbcast.lane.b32.xlu1 %v3628_v51, 360  ;;  %v1618_v15 = vpop.f32.mrb[95].mxu0 }
 0x3b9   : > { %2013 = vst [vmem:[%s3704_s9 + $0x1b0] sm:$0xff] %v1949_v43  ;;  %1973 = vst [vmem:[%s3704_s9 + $0x70] sm:$0xff] %v1909_v23 }
 0x3ba   : > { %v1866_v47 = vpop.permute.xlu0 %1865  ;;  %v1693_v63 = vpop.permute.xlu1 %1692 }
 0x3bb   : > { %v1951_v7 = vadd.f32 %v1866_v47, %v1588_v13  ;;  %v1910_v6 = vadd.f32 %v3657_v62, %v1693_v63 }
 0x3bc   : > { %1893 = vbcast.lane.b32.xlu1 %v3628_v51, 376 }
 0x3bd   : > { %2015 = vst [vmem:[%s3704_s9 + $0x1c0] sm:$0xff] %v1951_v7  ;;  %1974 = vst [vmem:[%s3704_s9 + $0x78] sm:$0xff] %v1910_v6 }
 0x3be   : > { %v1874_v61 = vpop.permute.xlu0 %1873  ;;  %v1704_v5 = vpop.permute.xlu1 %1703 }
 0x3bf   : > { %v1953_v11 = vadd.f32 %v1874_v61, %v1598_v45  ;;  %v1912_v22 = vadd.f32 %v3662_v14, %v1704_v5 }
 0x3c1   : > { %2017 = vst [vmem:[%s3704_s9 + $0x1d0] sm:$0xff] %v1953_v11  ;;  %1976 = vst [vmem:[%s3704_s9 + $0x88] sm:$0xff] %v1912_v22 }
 0x3c2   : > { %v1882_v57 = vpop.permute.xlu0 %1881  ;;  %v1708_v33 = vpop.permute.xlu1 %1707 }
 0x3c3   : > { %v1955_v41 = vadd.f32 %v1882_v57, %v1608_v58  ;;  %v1913_v62 = vadd.f32 %v1708_v33, %v3668_v29 }
 0x3c5   : > { %2019 = vst [vmem:[%s3704_s9 + $0x1e0] sm:$0xff] %v1955_v41  ;;  %1977 = vst [vmem:[%s3704_s9 + $0x90] sm:$0xff] %v1913_v62 }
 0x3c6   : > { %v1890_v51 = vpop.permute.xlu0 %1889  ;;  %v1712_v50 = vpop.permute.xlu1 %1711 }
 0x3c7   : > { %v1957_v48 = vadd.f32 %v1890_v51, %v1618_v15  ;;  %v1914_v56 = vadd.f32 %v3665_v27, %v1712_v50 }
 0x3c9   : > { %2021 = vst [vmem:[%s3704_s9 + $0x1f0] sm:$0xff] %v1957_v48  ;;  %1978 = vst [vmem:[%s3704_s9 + $0x98] sm:$0xff] %v1914_v56 }
 0x3ca   : > { %v1716_v14 = vpop.permute.xlu1 %1715 }
 0x3cb   : > { %v1915_v42 = vadd.f32 %v1716_v14, %v3673_v37 }
 0x3cd   : > { %1979 = vst [vmem:[%s3704_s9 + $0xa0] sm:$0xff] %v1915_v42 }
 0x3ce   : > { %v1720_v3 = vpop.permute.xlu1 %1719 }
 0x3cf   : > { %v1916_v29 = vadd.f32 %v3670_v60, %v1720_v3 }
 0x3d1   : > { %1980 = vst [vmem:[%s3704_s9 + $0xa8] sm:$0xff] %v1916_v29 }
 0x3d2   : > { %v1724_v18 = vpop.permute.xlu1 %1723 }
 0x3d3   : > { %v1917_v13 = vadd.f32 %v1724_v18, %v3678_v16 }
 0x3d5   : > { %1981 = vst [vmem:[%s3704_s9 + $0xb0] sm:$0xff] %v1917_v13 }
 0x3d6   : > { %v1728_v12 = vpop.permute.xlu1 %1727 }
 0x3d7   : > { %v1918_v27 = vadd.f32 %v3675_v34, %v1728_v12 }
 0x3d9   : > { %1982 = vst [vmem:[%s3704_s9 + $0xb8] sm:$0xff] %v1918_v27 }
 0x3da   : > { %v1732_v35 = vpop.permute.xlu1 %1731 }
 0x3db   : > { %v1919_v37 = vadd.f32 %v1732_v35, %v3683_v59 }
 0x3dd   : > { %1983 = vst [vmem:[%s3704_s9 + $0xc0] sm:$0xff] %v1919_v37 }
 0x3de   : > { %v1736_v54 = vpop.permute.xlu1 %1735 }
 0x3df   : > { %v1920_v60 = vadd.f32 %v3680_v53, %v1736_v54 }
 0x3e1   : > { %1984 = vst [vmem:[%s3704_s9 + $0xc8] sm:$0xff] %v1920_v60 }
 0x3e2   : > { %v1740_v30 = vpop.permute.xlu1 %1739 }
 0x3e3   : > { %v1921_v16 = vadd.f32 %v1740_v30, %v3688_v10 }
 0x3e5   : > { %1985 = vst [vmem:[%s3704_s9 + $0xd0] sm:$0xff] %v1921_v16 }
 0x3e6   : > { %v1744_v45 = vpop.permute.xlu1 %1743 }
 0x3e7   : > { %v1922_v34 = vadd.f32 %v3685_v2, %v1744_v45 }
 0x3e9   : > { %1986 = vst [vmem:[%s3704_s9 + $0xd8] sm:$0xff] %v1922_v34 }
 0x3ea   : > { %v1752_v39 = vpop.permute.xlu1 %1751 }
 0x3eb   : > { %v1924_v59 = vadd.f32 %v3690_v8, %v1752_v39 }
 0x3ed   : > { %1988 = vst [vmem:[%s3704_s9 + $0xe8] sm:$0xff] %v1924_v59 }
 0x3ee   : > { %v1760_v32 = vpop.permute.xlu1 %1759 }
 0x3ef   : > { %v1926_v53 = vadd.f32 %v3693_v21, %v1760_v32 }
 0x3f1   : > { %1990 = vst [vmem:[%s3704_s9 + $0xf8] sm:$0xff] %v1926_v53 }
 0x3f2   : > { %v1771_v31 = vpop.permute.xlu1 %1770 }
 0x3f3   : > { %v1928_v10 = vadd.f32 %v3696_v24, %v1771_v31 }
 0x3f5   : > { %1992 = vst [vmem:[%s3704_s9 + $0x108] sm:$0xff] %v1928_v10 }
 0x3f6   : > { %v1779_v38 = vpop.permute.xlu1 %1778 }
 0x3f7   : > { %v1930_v2 = vadd.f32 %v3701_v52, %v1779_v38 }
 0x3f9   : > { %1994 = vst [vmem:[%s3704_s9 + $0x118] sm:$0xff] %v1930_v2 }
 0x3fa   : > { %v1787_v58 = vpop.permute.xlu1 %1786 }
 0x3fb   : > { %v1932_v8 = vadd.f32 %v3709_v9, %v1787_v58 }
 0x3fd   : > { %1996 = vst [vmem:[%s3704_s9 + $0x128] sm:$0xff] %v1932_v8 }
 0x3fe   : > { %v1795_v1 = vpop.permute.xlu1 %1794 }
 0x3ff   : > { %v1934_v21 = vadd.f32 %v3715_v25, %v1795_v1 }
 0x401   : > { %1998 = vst [vmem:[%s3704_s9 + $0x138] sm:$0xff] %v1934_v21 }
 0x402   : > { %v1803_v0 = vpop.permute.xlu1 %1802 }
 0x403   : > { %v1936_v24 = vadd.f32 %v3721_v28, %v1803_v0 }
 0x405   : > { %2000 = vst [vmem:[%s3704_s9 + $0x148] sm:$0xff] %v1936_v24 }
 0x406   : > { %v1811_v43 = vpop.permute.xlu1 %1810 }
 0x407   : > { %v1938_v52 = vadd.f32 %v3727_v40, %v1811_v43 }
 0x409   : > { %2002 = vst [vmem:[%s3704_s9 + $0x158] sm:$0xff] %v1938_v52 }
 0x40a   : > { %v1819_v23 = vpop.permute.xlu1 %1818 }
 0x40b   : > { %v1940_v9 = vadd.f32 %v3733_v19, %v1819_v23 }
 0x40d   : > { %2004 = vst [vmem:[%s3704_s9 + $0x168] sm:$0xff] %v1940_v9 }
 0x40e   : > { %v1827_v15 = vpop.permute.xlu1 %1826 }
 0x40f   : > { %v1942_v25 = vadd.f32 %v3739_v46, %v1827_v15 }
 0x411   : > { %2006 = vst [vmem:[%s3704_s9 + $0x178] sm:$0xff] %v1942_v25 }
 0x412   : > { %v1838_v47 = vpop.permute.xlu1 %1837 }
 0x413   : > { %v1944_v28 = vadd.f32 %v3745_v26, %v1838_v47 }
 0x415   : > { %2008 = vst [vmem:[%s3704_s9 + $0x188] sm:$0xff] %v1944_v28 }
 0x416   : > { %v1846_v63 = vpop.permute.xlu1 %1845 }
 0x417   : > { %v1946_v40 = vadd.f32 %v3751_v49, %v1846_v63 }
 0x419   : > { %2010 = vst [vmem:[%s3704_s9 + $0x198] sm:$0xff] %v1946_v40 }
 0x41a   : > { %v1854_v7 = vpop.permute.xlu1 %1853 }
 0x41b   : > { %v1948_v19 = vadd.f32 %v3757_v17, %v1854_v7 }
 0x41d   : > { %2012 = vst [vmem:[%s3704_s9 + $0x1a8] sm:$0xff] %v1948_v19 }
 0x41e   : > { %v1862_v6 = vpop.permute.xlu1 %1861 }
 0x41f   : > { %v1950_v46 = vadd.f32 %v3763_v44, %v1862_v6 }
 0x421   : > { %2014 = vst [vmem:[%s3704_s9 + $0x1b8] sm:$0xff] %v1950_v46 }
 0x422   : > { %v1870_v61 = vpop.permute.xlu1 %1869 }
 0x423   : > { %v1952_v26 = vadd.f32 %v3769_v20, %v1870_v61 }
 0x425   : > { %2016 = vst [vmem:[%s3704_s9 + $0x1c8] sm:$0xff] %v1952_v26 }
 0x426   : > { %v1878_v5 = vpop.permute.xlu1 %1877 }
 0x427   : > { %v1954_v49 = vadd.f32 %v3775_v36, %v1878_v5 }
 0x429   : > { %2018 = vst [vmem:[%s3704_s9 + $0x1d8] sm:$0xff] %v1954_v49 }
 0x42a   : > { %v1886_v11 = vpop.permute.xlu1 %1885 }
 0x42b   : > { %v1956_v22 = vadd.f32 %v3781_v55, %v1886_v11 }
 0x42d   : > { %2020 = vst [vmem:[%s3704_s9 + $0x1e8] sm:$0xff] %v1956_v22 }
 0x42e   : > { %v1894_v17 = vpop.permute.xlu1 %1893 }
 0x42f   : > { %v1958_v44 = vadd.f32 %v3787_v4, %v1894_v17 }
 0x431   : > { %2022 = vst [vmem:[%s3704_s9 + $0x1f8] sm:$0xff] %v1958_v44 }
 0x432   : > { %2890 = shalt.err (!%p2887_p11)
}
 0x433   : > { %s2891_s28 = scalar_lea.hbm %s3860_s16, 8192  ;;  %s2895_s6 = scalar_lea.hbm %s3918_s5, 16384 }
 0x434   : > { %p2892_p0 = scmp.ne.s32.totalorder %s3860_s16, %s2891_s28  ;;  %p2896_p6 = scmp.lt.u32.totalorder %s3860_s16, %s3918_s5 }
 0x435   : > { %p2897_p7 = scmp.lt.u32.totalorder %s2895_s6, %s2891_s28  ;;  %p2899_p8 = scmp.lt.u32.totalorder %s2891_s28, %s3860_s16 }
 0x436   : > { %p2893_p4 = pnand %p2892_p0, %p3933_p12 }
 0x437   : > { %p2898_p2 = por %p2897_p7, %p2896_p6 }
 0x438   : > { %p2894_p13 = pneg %p2893_p4 }
 0x439   : > { %p2900_p1 = por %p2899_p8, %p2898_p2 }
 0x43b   : > { %p2901_p10 = pnand %p2900_p1, %p2894_p13 }
 0x43d   : > { %2904 = shalt.err (!%p2901_p10)
}
 0x43e   : > { %s2976_s10 = smov 128   ;;  %s2977_s13 = smov 8  }
 0x43f   : > { %2645 = dma.vmem_to_hbm [thread:$0]  (%p3933_p12), %s3862_s8, 8192, %s3860_s16, %s2024_s7, %s2976_s10, %s2976_s10, %s2977_s13  }
 0x440 PF: > { %s2055_s15 = sand.u32 1, %s2943_s18   ;;  %p3934_p3 = scmp.ne.s32.totalorder %s3926_s29, 0 }
 0x441   : > { %p3935_p5 = scmp.ge.s32.totalorder %s2963_s23, 2  ;;  %s2056_s21 = scalar_lea.sflag [#allocation5], %s2055_s15 }
 0x443   : > { %p2659_p9 = pnand %p3935_p5, %p3934_p3 }
 0x445   : > { %2938 = dma.done.wait (!%p2659_p9), %s2056_s21, 8192  }
 0x446   : > { %2940 = vsyncadd (!%p2659_p9), %s2056_s21, 4294959104  ;;  %s22_s23 = sadd.s32 1, %s2963_s23   ;;  %s3936_s18 = smov %s2947_s19 }
 0x447   : > { %p19_p11 = scmp.ge.s32.totalorder %s22_s23, 4   ;;  %s3937_s19 = smov %s2951_s20 }
 0x448   : > { %s3938_s20 = smov %s3150_s17  ;;  %s3939_s21 = smov %s2959_s22 }
 0x449   : > { %s3940_s22 = smov %s3942_s12  ;;  %21 = sbr.rel (!%p19_p11) target bundleno = 7 (0x7), region = 101 }
 0x450   :  { %2061 = vsyncpa [#allocation4], 1 }
 0x451   :  { %2063 = vsyncpa [#allocation4 + $0x1], 1 }
 0x452   :  { %2064 = vsyncpa [#allocation7], 1 }
 0x453   :  { %2065 = vsyncpa [#allocation5], 1 }
 0x454   :  { %2067 = vsyncpa [#allocation5 + $0x1], 1 }

</bundles_post_ra>
